<compile_context>
chip_gen: v7x
topology: tpu7x:2x2x1
jax: 0.10.0
libtpu: 0.0.40
codegen_flags: <defaults>
</compile_context>

<pallas_src>
import functools

import jax
import jax.numpy as jnp
from jax.experimental import pallas as pl
from jax.experimental.pallas import tpu as pltpu


def _linear_net_kernel(state_ref, act_ref, gw_s_ref, w_gw_ref, w_ones_ref,
                       scal_ref, out_ref, *, normalize: bool, inv_d: float,
                       eps: float = 1e-5):
    # state_ref : (TB, Ds)    VMEM  (last timestep only, pre-sliced in wrapper)
    # act_ref   : (TB, A*Da)  VMEM  (flattened, lane-dense)
    # gw_s_ref  : (1, Ds)     VMEM  (gamma*w restricted to state features)
    # w_gw_ref  : (A*Da, A)   VMEM  block-diag: col j holds gw_a in rows j*Da:(j+1)*Da
    # w_ones_ref: (A*Da, A)   VMEM  block-diag of ones (per-action segment sums)
    # scal_ref  : (1, 2)      SMEM  [G = sum(gw), offset = beta.w + b]
    # out_ref   : (TB, A)     VMEM
    f32 = jnp.float32
    hi = jax.lax.Precision.HIGHEST

    s = state_ref[...].astype(f32)                          # (TB, Ds)
    a = act_ref[...].astype(f32)                            # (TB, A*Da)
    gw_s = gw_s_ref[...]                                    # (1, Ds)
    offset = scal_ref[0, 1]

    # Linear part, decomposed over the concat: dot(x_j, gw) = dot(s, gw_s) + dot(a_j, gw_a)
    ds = jnp.sum(s * gw_s, axis=-1, keepdims=True)          # (TB, 1)   VPU/XLU
    da = jnp.dot(a, w_gw_ref[...], precision=hi,
                 preferred_element_type=f32)                # (TB, A)   MXU (idle otherwise)

    if normalize:
        g_sum = scal_ref[0, 0]
        w_ones = w_ones_ref[...]
        sum_s = jnp.sum(s, axis=-1, keepdims=True)          # (TB, 1)
        ssq_s = jnp.sum(s * s, axis=-1, keepdims=True)      # (TB, 1)
        sum_a = jnp.dot(a, w_ones, precision=hi,
                        preferred_element_type=f32)         # (TB, A)
        ssq_a = jnp.dot(a * a, w_ones, precision=hi,
                        preferred_element_type=f32)         # (TB, A)
        mean = (sum_s + sum_a) * inv_d                      # (TB, A)
        var = (ssq_s + ssq_a) * inv_d - mean * mean         # biased var, as nn.LayerNorm
        rstd = jax.lax.rsqrt(var + eps)
        q = rstd * (ds + da - mean * g_sum) + offset        # (TB, A)
    else:
        q = ds + da + offset

    out_ref[...] = q.astype(out_ref.dtype)


def _pick_batch_tile(B: int, block_b: int) -> int:
    """Rows per grid step: multiple of 8 sublanes, >= 2 balanced tiles when possible
    (keeps both v7x TensorCores fed via dimension_semantics=("parallel",))."""
    if B <= 8:
        return B                                   # single tile == full array dim
    cap = max(8, (min(block_b, B) // 8) * 8)       # respect requested cap, sublane-aligned
    n_tiles = max(2, pl.cdiv(B, cap))              # at least 2 tiles for megacore
    tb = pl.cdiv(B, n_tiles)                       # balanced split
    tb = ((tb + 7) // 8) * 8                       # round up to sublane multiple
    return min(tb, cap)


def linear_network_forward(states, action_features, params, *,
                           normalize: bool, block_b: int = 2048):
    """states: (B, T, Ds); action_features: (B, A, Da) -> (B, A) f32."""
    B, T, Ds = states.shape
    _, A, Da = action_features.shape
    D = Ds + Da

    if A == 0:                                     # module's empty-action-space branch
        return jnp.zeros((B, 0), dtype=jnp.float32)

    w = params["w"].astype(jnp.float32).reshape(D)
    b = params["b"].astype(jnp.float32).reshape(())
    if normalize:
        gamma = params["gamma"].astype(jnp.float32).reshape(D)
        beta = params["beta"].astype(jnp.float32).reshape(D)
        gw = gamma * w                             # fold LayerNorm affine into linear weight
        offset = jnp.dot(beta, w) + b
    else:
        gw = w
        offset = b
    gw_s = gw[:Ds].reshape(1, Ds)
    gw_a = gw[Ds:]                                                  # (Da,)
    # Block-diagonal per-action reduction matrices (A*Da, A), built once on the host.
    w_ones = jnp.repeat(jnp.eye(A, dtype=jnp.float32), Da, axis=0)  # ones blocks
    w_gw = w_ones * jnp.tile(gw_a, A)[:, None]                      # gw_a blocks
    scal = jnp.stack([jnp.sum(gw), offset]).reshape(1, 2)           # [G, offset] -> SMEM

    # Layout plumbing on the host: contiguous last-timestep slice + lane-dense actions.
    state_last = states[:, -1, :]                   # (B, Ds) contiguous (cheap XLA slice)
    act_flat = action_features.reshape(B, A * Da)   # free reshape

    tb = _pick_batch_tile(B, block_b)
    grid_b = pl.cdiv(B, tb)

    kernel = functools.partial(_linear_net_kernel,
                               normalize=normalize, inv_d=1.0 / D)

    out = pl.pallas_call(
        kernel,
        out_shape=jax.ShapeDtypeStruct((B, A), jnp.float32),
        grid_spec=pltpu.PrefetchScalarGridSpec(
            num_scalar_prefetch=0,
            grid=(grid_b,),
            in_specs=[
                pl.BlockSpec((tb, Ds), lambda bi: (bi, 0)),
                pl.BlockSpec((tb, A * Da), lambda bi: (bi, 0)),
                pl.BlockSpec((1, Ds), lambda bi: (0, 0)),
                pl.BlockSpec((A * Da, A), lambda bi: (0, 0)),
                pl.BlockSpec((A * Da, A), lambda bi: (0, 0)),
                pl.BlockSpec((1, 2), lambda bi: (0, 0),
                             memory_space=pltpu.SMEM),
            ],
            out_specs=pl.BlockSpec((tb, A), lambda bi: (bi, 0)),
        ),
        # ~8.5 MiB of double-buffered VMEM at tb=2048 -> fits the default scoped limit
        # on v5e (16 MiB) and v6e/v7x (32 MiB); no vmem_limit_bytes override needed.
        compiler_params=pltpu.CompilerParams(
            dimension_semantics=("parallel",)),     # batch tiles split across v7x TCs
    )(state_last, act_flat, gw_s, w_gw, w_ones, scal)

    return out


def _reference(states, action_features, params, *, normalize: bool):
    state = states[:, -1, :]
    A = action_features.shape[1]
    s_b = jnp.broadcast_to(state[:, None, :],
                           (state.shape[0], A, state.shape[1]))
    x = jnp.concatenate([s_b, action_features], axis=-1)
    if normalize:
        mean = jnp.mean(x, axis=-1, keepdims=True)
        var = jnp.mean((x - mean) ** 2, axis=-1, keepdims=True)
        x = (x - mean) / jnp.sqrt(var + 1e-5)
        x = x * params["gamma"] + params["beta"]
    return jnp.sum(x * params["w"], axis=-1) + params["b"]


if __name__ == "__main__":
    key = jax.random.PRNGKey(0)
    B, T, A = 20, 5, 8           # batch, seq len (history), num actions
    state_dim, action_dim = 12, 20
    D = state_dim + action_dim

    k1, k2, k3, k4, k5, k6 = jax.random.split(key, 6)
    states = jax.random.normal(k1, (B, T, state_dim), dtype=jnp.float32)
    action_features = jax.random.normal(k2, (B, A, action_dim), dtype=jnp.float32)

    # nn.Linear(D,1) + nn.LayerNorm(D)-shaped params (non-trivial affine to exercise folding).
    bound = 1.0 / jnp.sqrt(jnp.float32(D))
    params = {
        "w": jax.random.uniform(k3, (D,), jnp.float32, -bound, bound),
        "b": jax.random.uniform(k4, (), jnp.float32, -bound, bound),
        "gamma": 1.0 + 0.1 * jax.random.normal(k5, (D,), jnp.float32),
        "beta": 0.1 * jax.random.normal(k6, (D,), jnp.float32),
    }

    # block_b=8 exercises a 3-tile grid with a partial last tile; block_b=2048 exercises
    # the production path (tile picker still forces >= 2 balanced tiles for megacore).
    for normalize in (True, False):
        for block_b in (8, 2048):
            q = linear_network_forward(states, action_features, params,
                                       normalize=normalize, block_b=block_b)
            q = jax.block_until_ready(q)
            q_ref = _reference(states, action_features, params, normalize=normalize)
            assert q.shape == (B, A)
            err = float(jnp.max(jnp.abs(q - q_ref)))
            assert jnp.allclose(q, q_ref, atol=1e-3, rtol=1e-3), (normalize, block_b, err)

    # TODO(synk): list-of-sequences / 2-D / 1-D input branches of forward() are Python-level
    # glue (pack_sequence etc.) and are not part of the kernel; only the 3-D path is implemented.
    print("KERNEL_OK")
</pallas_src>

<mosaic_0001>
module attributes {stable_mosaic.version = 11 : i64} {
  func.func @_linear_net_kernel(%arg0: i32, %arg1: memref<8x12xf32, #tpu.memory_space<vmem>>, %arg2: memref<8x160xf32, #tpu.memory_space<vmem>>, %arg3: memref<1x12xf32, #tpu.memory_space<vmem>>, %arg4: memref<160x8xf32, #tpu.memory_space<vmem>>, %arg5: memref<160x8xf32, #tpu.memory_space<vmem>>, %arg6: memref<1x2xf32, #tpu.memory_space<smem>>, %arg7: memref<8x8xf32, #tpu.memory_space<vmem>>) attributes {dimension_semantics = [#tpu.dimension_semantics<parallel>], iteration_bounds = array<i64: 3>, scalar_prefetch = 0 : i64, scratch_operands = 0 : i64, tpu.core_type = #tpu.core_type<tc>, window_params = [{transform_indices = @transform_0, window_bounds = array<i64: 8, 12>}, {transform_indices = @transform_1, window_bounds = array<i64: 8, 160>}, {pipeline_mode = #tpu.pipeline_mode<synchronous>, transform_indices = @transform_2, window_bounds = array<i64: 1, 12>}, {pipeline_mode = #tpu.pipeline_mode<synchronous>, transform_indices = @transform_3, window_bounds = array<i64: 160, 8>}, {pipeline_mode = #tpu.pipeline_mode<synchronous>, transform_indices = @transform_4, window_bounds = array<i64: 160, 8>}, {transform_indices = @transform_5, window_bounds = array<i64: 1, 2>}, {transform_indices = @transform_6, window_bounds = array<i64: 8, 8>}]} {
    %c0 = arith.constant 0 : index
    %c0_0 = arith.constant 0 : index
    %0 = vector.load %arg1[%c0, %c0_0] : memref<8x12xf32, #tpu.memory_space<vmem>>, vector<8x12xf32>
    %c0_1 = arith.constant 0 : index
    %c0_2 = arith.constant 0 : index
    %1 = vector.load %arg2[%c0_1, %c0_2] : memref<8x160xf32, #tpu.memory_space<vmem>>, vector<8x160xf32>
    %c0_3 = arith.constant 0 : index
    %c0_4 = arith.constant 0 : index
    %2 = vector.load %arg3[%c0_3, %c0_4] : memref<1x12xf32, #tpu.memory_space<vmem>>, vector<1x12xf32>
    %c0_5 = arith.constant 0 : index
    %c1 = arith.constant 1 : index
    %3 = memref.load %arg6[%c0_5, %c1] : memref<1x2xf32, #tpu.memory_space<smem>>
    %4 = vector.broadcast %2 : vector<1x12xf32> to vector<8x12xf32>
    %5 = arith.mulf %0, %4 : vector<8x12xf32>
    %cst = arith.constant dense<0.000000e+00> : vector<8xf32>
    %6 = vector.multi_reduction <add>, %5, %cst [1] : vector<8x12xf32> to vector<8xf32>
    %7 = vector.shape_cast %6 : vector<8xf32> to vector<8x1xf32>
    %c0_6 = arith.constant 0 : index
    %c0_7 = arith.constant 0 : index
    %8 = vector.load %arg4[%c0_6, %c0_7] : memref<160x8xf32, #tpu.memory_space<vmem>>, vector<160x8xf32>
    %cst_8 = arith.constant dense<0.000000e+00> : vector<8x8xf32>
    %9 = tpu.matmul %1, %8, %cst_8 {dimension_numbers = #tpu.dot_dimension_numbers<[1], [0], [0], [1], [0, 0, 1, 1], [], []>, precision = #tpu.contract_precision<fp32>} : vector<8x160xf32>, vector<160x8xf32>, vector<8x8xf32> -> vector<8x8xf32>
    %c0_9 = arith.constant 0 : index
    %c0_10 = arith.constant 0 : index
    %10 = memref.load %arg6[%c0_9, %c0_10] : memref<1x2xf32, #tpu.memory_space<smem>>
    %c0_11 = arith.constant 0 : index
    %c0_12 = arith.constant 0 : index
    %11 = vector.load %arg5[%c0_11, %c0_12] : memref<160x8xf32, #tpu.memory_space<vmem>>, vector<160x8xf32>
    %cst_13 = arith.constant dense<0.000000e+00> : vector<8xf32>
    %12 = vector.multi_reduction <add>, %0, %cst_13 [1] : vector<8x12xf32> to vector<8xf32>
    %13 = vector.shape_cast %12 : vector<8xf32> to vector<8x1xf32>
    %14 = arith.mulf %0, %0 : vector<8x12xf32>
    %cst_14 = arith.constant dense<0.000000e+00> : vector<8xf32>
    %15 = vector.multi_reduction <add>, %14, %cst_14 [1] : vector<8x12xf32> to vector<8xf32>
    %16 = vector.shape_cast %15 : vector<8xf32> to vector<8x1xf32>
    %cst_15 = arith.constant dense<0.000000e+00> : vector<8x8xf32>
    %17 = tpu.matmul %1, %11, %cst_15 {dimension_numbers = #tpu.dot_dimension_numbers<[1], [0], [0], [1], [0, 0, 1, 1], [], []>, precision = #tpu.contract_precision<fp32>} : vector<8x160xf32>, vector<160x8xf32>, vector<8x8xf32> -> vector<8x8xf32>
    %18 = arith.mulf %1, %1 : vector<8x160xf32>
    %cst_16 = arith.constant dense<0.000000e+00> : vector<8x8xf32>
    %19 = tpu.matmul %18, %11, %cst_16 {dimension_numbers = #tpu.dot_dimension_numbers<[1], [0], [0], [1], [0, 0, 1, 1], [], []>, precision = #tpu.contract_precision<fp32>} : vector<8x160xf32>, vector<160x8xf32>, vector<8x8xf32> -> vector<8x8xf32>
    %20 = vector.broadcast %13 : vector<8x1xf32> to vector<8x8xf32>
    %21 = arith.addf %20, %17 : vector<8x8xf32>
    %cst_17 = arith.constant 3.125000e-02 : f32
    %22 = vector.broadcast %cst_17 : f32 to vector<8x8xf32>
    %23 = arith.mulf %21, %22 : vector<8x8xf32>
    %24 = vector.broadcast %16 : vector<8x1xf32> to vector<8x8xf32>
    %25 = arith.addf %24, %19 : vector<8x8xf32>
    %cst_18 = arith.constant 3.125000e-02 : f32
    %26 = vector.broadcast %cst_18 : f32 to vector<8x8xf32>
    %27 = arith.mulf %25, %26 : vector<8x8xf32>
    %28 = arith.mulf %23, %23 : vector<8x8xf32>
    %29 = arith.subf %27, %28 : vector<8x8xf32>
    %cst_19 = arith.constant 9.99999974E-6 : f32
    %30 = vector.broadcast %cst_19 : f32 to vector<8x8xf32>
    %31 = arith.addf %29, %30 : vector<8x8xf32>
    %32 = math.rsqrt %31 : vector<8x8xf32>
    %33 = vector.broadcast %7 : vector<8x1xf32> to vector<8x8xf32>
    %34 = arith.addf %33, %9 : vector<8x8xf32>
    %35 = vector.broadcast %10 : f32 to vector<8x8xf32>
    %36 = arith.mulf %23, %35 : vector<8x8xf32>
    %37 = arith.subf %34, %36 : vector<8x8xf32>
    %38 = arith.mulf %32, %37 : vector<8x8xf32>
    %39 = vector.broadcast %3 : f32 to vector<8x8xf32>
    %40 = arith.addf %38, %39 : vector<8x8xf32>
    %c0_20 = arith.constant 0 : index
    %c0_21 = arith.constant 0 : index
    %41 = vector.load %arg7[%c0_20, %c0_21] : memref<8x8xf32, #tpu.memory_space<vmem>>, vector<8x8xf32>
    tpu.vector_store %arg7[%c0_20, %c0_21], %40 {strides = array<i32>} : memref<8x8xf32, #tpu.memory_space<vmem>>, vector<8x8xf32>,
    return
  }
  func.func @transform_0(%arg0: i32) -> (i32, i32) {
    %c0_i32 = arith.constant 0 : i32
    %c0_i32_0 = arith.constant 0 : i32
    return %arg0, %c0_i32 : i32, i32
  }
  func.func @transform_1(%arg0: i32) -> (i32, i32) {
    %c0_i32 = arith.constant 0 : i32
    %c0_i32_0 = arith.constant 0 : i32
    return %arg0, %c0_i32 : i32, i32
  }
  func.func @transform_2(%arg0: i32) -> (i32, i32) {
    %c0_i32 = arith.constant 0 : i32
    %c0_i32_0 = arith.constant 0 : i32
    %c0_i32_1 = arith.constant 0 : i32
    return %c0_i32, %c0_i32_0 : i32, i32
  }
  func.func @transform_3(%arg0: i32) -> (i32, i32) {
    %c0_i32 = arith.constant 0 : i32
    %c0_i32_0 = arith.constant 0 : i32
    %c0_i32_1 = arith.constant 0 : i32
    return %c0_i32, %c0_i32_0 : i32, i32
  }
  func.func @transform_4(%arg0: i32) -> (i32, i32) {
    %c0_i32 = arith.constant 0 : i32
    %c0_i32_0 = arith.constant 0 : i32
    %c0_i32_1 = arith.constant 0 : i32
    return %c0_i32, %c0_i32_0 : i32, i32
  }
  func.func @transform_5(%arg0: i32) -> (i32, i32) {
    %c0_i32 = arith.constant 0 : i32
    %c0_i32_0 = arith.constant 0 : i32
    %c0_i32_1 = arith.constant 0 : i32
    return %c0_i32, %c0_i32_0 : i32, i32
  }
  func.func @transform_6(%arg0: i32) -> (i32, i32) {
    %c0_i32 = arith.constant 0 : i32
    %c0_i32_0 = arith.constant 0 : i32
    return %arg0, %c0_i32 : i32, i32
  }
}

</mosaic_0001>

<bundles_post_ra>
// kernel: tpu_custom_call.1
= control target key start
LH: loop header
LB: loop body
LE: loop exit
PB: predicated region body
PF: predicated region fallthrough
CT: control target
= control target key end

     0   :  { %11 = vsyncpa [#allocation3], 0  ;;  %s3208_s21 = smov 0   ;;  %s4463_s0 = inlined_call_operand.vmem [shape: f32[20,12], index: 0, kind: input, shape index: {}]   ;;  %s4464_s1 = inlined_call_operand.vmem [shape: f32[20,160], index: 1, kind: input, shape index: {}]   ;;  %s4465_s2 = inlined_call_operand.vmem [shape: f32[1,12], index: 2, kind: input, shape index: {}]   ;;  %s4466_s3 = inlined_call_operand.vmem [shape: f32[160,8], index: 3, kind: input, shape index: {}]   ;;  %s4467_s4 = inlined_call_operand.vmem [shape: f32[160,8], index: 4, kind: input, shape index: {}]   ;;  %s4468_s5 = inlined_call_operand.vmem [shape: f32[1,2], index: 5, kind: input, shape index: {}]   ;;  %s4469_s6 = inlined_call_operand.vmem [shape: f32[20,8], index: 6, kind: output, shape index: {}]  }
   0x1 LB: > { %s3214_s22 = sadd.s32 4294967295, %s3169_s21   ;;  %p2568_p0 = scmp.ge.s32.totalorder %s3169_s21, 1  ;;  %s3169_s21 = sphi %s3208_s21, %s17_s21  }
   0x2   : > { %p184_p1 = scmp.lt.s32.totalorder %s3169_s21, 4  ;;  %s206_s25 = sshll.u32 %s4468_s5, 4  ;;  %s207_s25 = int_to_ptr.vmem [resolvable:$true] %s206_s25 }
   0x3   : > { %p3130_p3 = scmp.eq.s32.totalorder %s3214_s22, 0  ;;  %s3144_s27 = scalar_lea.vmem %s207_s25, 16 }
   0x4   : > { %p3221_p2 = pnand %p2568_p0, %p184_p1  ;;  %p3145_p6 = scmp.ne.s32.totalorder %s207_s25, %s3144_s27 }
   0x5   : > { %p3152_p10 = scmp.lt.s32.totalorder %s207_s25, %s207_s25  ;;  %p3153_p11 = scmp.lt.s32.totalorder %s3144_s27, %s3144_s27 }
   0x6   : > { %p3126_p4 = pneg %p3221_p2 }
   0x7   : > { %p3154_p12 = por %p3153_p11, %p3152_p10 }
   0x8   : > { %p3127_p5 = pnand %p3130_p3, %p3126_p4 }
   0xa   : > { %p3146_p7 = pneg %p3127_p5 }
   0xc   : > { %p3147_p8 = pnand %p3146_p7, %p3145_p6 }
   0xe   : > { %p3148_p9 = pneg %p3147_p8 }
  0x10   : > { %p3155_p13 = pnand %p3154_p12, %p3148_p9 }
  0x12   : > { %3158 = shalt.err (!%p3155_p13)
}
  0x13   : > { %s3171_s28 = smov [#allocation2]   ;;  %234 = sbr.rel (%p3221_p2) target bundleno = 639 (0x27f), region = 44 }
  0x14   : > { %3129 = dma.vmem_to_smem (!%p3127_p5), %s207_s25, 16, %s3171_s28, [#allocation3]  }
  0x1a   : > { %3164 = dma.done.wait (%p3130_p3), [#allocation3], 16  }
  0x1b   : > { %3166 = vsyncadd (%p3130_p3), [#allocation3], 4294967280 }
  0x1c   : > { %240 = sfence }
  0x1d   : > { %v297_v0 = vld [vmem:[%s4466_s3] sm:$0xff]  ;;  %v298_v1 = vld [vmem:[%s4466_s3 + $0x8] sm:$0xff]  ;;  %v299_v2 = vld [vmem:[%s4466_s3 + $0x10] sm:$0xff]  ;;  %v4480_v3 = vmov 0.0|0.0   ;;  %p268_p0 = scmp.lt.s32.totalorder %s3214_s22, 2  ;;  %vm317_vm0 = vcmask 261120  }
  0x1e   : > { %2582 = vmatprep.subr.bf16.mxu0 %v4480_v3  ;;  %v322_v4 = vand.u32 4294901760, %v297_v0  ;;  %v325_v5 = vand.u32 4294901760, %v298_v1  ;;  %v300_v6 = vld [vmem:[%s4466_s3 + $0x18] sm:$0xff]  ;;  %v328_v7 = vand.u32 4294901760, %v299_v2  ;;  %2612 = vmatprep.subr.bf16.mxu1 %v4480_v3  ;;  %v301_v8 = vld [vmem:[%s4466_s3 + $0x20] sm:$0xff]  ;;  %v302_v9 = vld [vmem:[%s4466_s3 + $0x28] sm:$0xff] }
  0x1f   : > { %v331_v10 = vand.u32 4294901760, %v300_v6  ;;  %v334_v11 = vand.u32 4294901760, %v301_v8  ;;  %v337_v12 = vand.u32 4294901760, %v302_v9  ;;  %v303_v13 = vld [vmem:[%s4466_s3 + $0x30] sm:$0xff]  ;;  %v304_v18 = vld [vmem:[%s4466_s3 + $0x38] sm:$0xff]  ;;  %v305_v19 = vld [vmem:[%s4466_s3 + $0x40] sm:$0xff] }
  0x20   : > { %v3259_v14 = vpack.c.bf16 %v325_v5, %v322_v4  ;;  %v3261_v15 = vsub.f32 %v297_v0, %v322_v4  ;;  %v3263_v16 = vsub.f32 %v298_v1, %v325_v5  ;;  %v3265_v17 = vsub.f32 %v299_v2, %v328_v7  ;;  %v306_v26 = vld [vmem:[%s4466_s3 + $0x48] sm:$0xff]  ;;  %v307_v39 = vld [vmem:[%s4466_s3 + $0x50] sm:$0xff]  ;;  %v308_v40 = vld [vmem:[%s4466_s3 + $0x58] sm:$0xff]  ;;  %s4615_s22 = smov (!%p268_p0, %s3214_s22), 2  ;;  %s1027_s8 = sld [smem:[#allocation2]] }
  0x21   : > { %v3273_v20 = vpack.c.bf16 %v331_v10, %v328_v7  ;;  %v3275_v21 = vsub.f32 %v300_v6, %v331_v10  ;;  %v3278_v22 = vsub.f32 %v301_v8, %v334_v11  ;;  %v340_v25 = vand.u32 4294901760, %v303_v13  ;;  %v3325_v49 = vld [vmem:[%s4466_s3 + $0x60] sm:$0xff]  ;;  %v310_v58 = vld [vmem:[%s4466_s3 + $0x68] sm:$0xff]  ;;  %v3353_v63 = vld [vmem:[%s4466_s3 + $0x70] sm:$0xff]  ;;  %s2581_s15 = sshll.u32 %s4615_s22, 4  ;;  %s2573_s17 = sshll.u32 %s4615_s22, 3 }
  0x22   : > { %2584 = vmatpush1.bf16.msra.mxu0 %v3259_v14  ;;  %v424_v23 = vand.u32 4294901760, %v3261_v15  ;;  %v431_v24 = vand.u32 4294901760, %v3263_v16  ;;  %v343_v27 = vand.u32 4294901760, %v304_v18  ;;  %v438_v28 = vand.u32 4294901760, %v3265_v17  ;;  %v3368_v5 = vld [vmem:[%s4466_s3 + $0x78] sm:$0xff]  ;;  %s276_s26 = scalar_lea.vmem %s4464_s1, %s2581_s15  ;;  %s271_s20 = scalar_lea.vmem %s4463_s0, %s2573_s17 }
  0x23   : > { %2585 = vmatprep.subr.bf16.mxu0 %v4480_v3  ;;  %v445_v29 = vand.u32 4294901760, %v3275_v21  ;;  %v346_v30 = vand.u32 4294901760, %v305_v19  ;;  %v3288_v31 = vsub.f32 %v302_v9, %v337_v12  ;;  %v3296_v34 = vsub.f32 %v303_v13, %v340_v25  ;;  %s2577_s9 = sld [smem:[#allocation2 + $0x1]]  ;;  %s280_s12 = scalar_lea.vmem %s4469_s6, %s2573_s17 }
  0x24   : > { %v425_v32 = vsub.f32 %v3261_v15, %v424_v23  ;;  %v432_v33 = vsub.f32 %v3263_v16, %v431_v24  ;;  %v3298_v35 = vsub.f32 %v304_v18, %v343_v27  ;;  %v439_v36 = vsub.f32 %v3265_v17, %v438_v28 }
  0x25   : > { %v446_v37 = vsub.f32 %v3275_v21, %v445_v29  ;;  %v349_v38 = vand.u32 4294901760, %v306_v26  ;;  %v3314_v41 = vpack.c.bf16 %v337_v12, %v334_v11  ;;  %v3316_v44 = vpack.c.bf16 %v343_v27, %v340_v25  ;;  %v3386_v27 = vld [vmem:[%s4466_s3 + $0x80] sm:$0xff] }
  0x26   : > { %2587 = vmatpush1.bf16.msra.mxu0 %v3273_v20  ;;  %v426_v42 = vand.u32 4294901760, %v425_v32  ;;  %v433_v43 = vand.u32 4294901760, %v432_v33  ;;  %v440_v45 = vand.u32 4294901760, %v439_v36  ;;  %v3319_v47 = vsub.f32 %v305_v19, %v346_v30 }
  0x27   : > { %2588 = vmatprep.subr.bf16.mxu0 %v4480_v3  ;;  %v447_v46 = vand.u32 4294901760, %v446_v37  ;;  %v452_v48 = vand.u32 4294901760, %v3278_v22  ;;  %v4479_v51 = vand.u32 4294901760, %v3288_v31  ;;  %v352_v52 = vand.u32 4294901760, %v307_v39  ;;  %v314_v37 = vld [vmem:[%s4466_s3 + $0x88] sm:$0xff] }
  0x28   : > { %v2613_v50 = vpack.c.bf16 %v433_v43, %v426_v42  ;;  %v355_v53 = vand.u32 4294901760, %v308_v40  ;;  %v3328_v54 = vsub.f32 %v306_v26, %v349_v38  ;;  %v4478_v56 = vand.u32 4294901760, %v3296_v34  ;;  %v3412_v43 = vld [vmem:[%s4466_s3 + $0x90] sm:$0xff] }
  0x29   : > { %v453_v55 = vsub.f32 %v3278_v22, %v452_v48  ;;  %v4477_v57 = vand.u32 4294901760, %v3298_v35  ;;  %v2616_v59 = vpack.c.bf16 %v447_v46, %v440_v45  ;;  %v3344_v60 = vpack.c.bf16 %v349_v38, %v346_v30 }
  0x2a   : > { %2590 = vmatpush1.bf16.msra.mxu0 %v3314_v41  ;;  %2614 = vmatpush1.bf16.msra.mxu1 %v2613_v50  ;;  %v460_v61 = vsub.f32 %v3288_v31, %v4479_v51  ;;  %v358_v62 = vand.u32 4294901760, %v3325_v49  ;;  %v3357_v1 = vsub.f32 %v307_v39, %v352_v52  ;;  %v467_v2 = vsub.f32 %v3296_v34, %v4478_v56 }
  0x2b   : > { %2591 = vmatprep.subr.bf16.mxu0 %v4480_v3  ;;  %2615 = vmatprep.subr.bf16.mxu1 %v4480_v3  ;;  %v454_v0 = vand.u32 4294901760, %v453_v55  ;;  %v474_v4 = vsub.f32 %v3298_v35, %v4477_v57  ;;  %v3370_v7 = vsub.f32 %v308_v40, %v355_v53  ;;  %v361_v8 = vand.u32 4294901760, %v310_v58 }
  0x2c   : > { %v461_v6 = vand.u32 4294901760, %v460_v61  ;;  %v4476_v9 = vand.u32 4294901760, %v3319_v47  ;;  %v468_v10 = vand.u32 4294901760, %v467_v2  ;;  %v4475_v12 = vand.u32 4294901760, %v3328_v54 }
  0x2d   : > { %v475_v11 = vand.u32 4294901760, %v474_v4  ;;  %v364_v13 = vand.u32 4294901760, %v3353_v63  ;;  %v3378_v19 = vsub.f32 %v3325_v49, %v358_v62  ;;  %v3380_v25 = vsub.f32 %v310_v58, %v361_v8 }
  0x2e   : > { %2593 = vmatpush1.bf16.msra.mxu0 %v3316_v44  ;;  %2617 = vmatpush1.bf16.msra.mxu1 %v2616_v59  ;;  %v2619_v18 = vpack.c.bf16 %v461_v6, %v454_v0  ;;  %v367_v26 = vand.u32 4294901760, %v3368_v5  ;;  %v3390_v30 = vpack.c.bf16 %v355_v53, %v352_v52  ;;  %v481_v32 = vsub.f32 %v3319_v47, %v4476_v9  ;;  %v316_v59 = vld [vmem:[%s4466_s3 + $0x98] sm:$0xff] }
  0x2f   : > { %2594 = vmatprep.subr.bf16.mxu0 %v4480_v3  ;;  %2618 = vmatprep.subr.bf16.mxu1 %v4480_v3  ;;  %v488_v33 = vsub.f32 %v3328_v54, %v4475_v12  ;;  %v4474_v36 = vand.u32 4294901760, %v3357_v1  ;;  %v2622_v38 = vpack.c.bf16 %v475_v11, %v468_v10  ;;  %v3403_v39 = vsub.f32 %v3353_v63, %v364_v13  ;;  %v3433_v63 = vld [vmem:[%s276_s26 + $0x8] sm:$0xff] }
  0x30   : > { %v3406_v40 = vsub.f32 %v3368_v5, %v367_v26  ;;  %v4472_v42 = vand.u32 4294901760, %v3370_v7  ;;  %v482_v45 = vand.u32 4294901760, %v481_v32  ;;  %v370_v50 = vand.u32 4294901760, %v3386_v27  ;;  %4525 = vst [vmem:[#allocation5_spill] sm:$0xff] %v3433_v63  ;;  %v3444_v32 = vld [vmem:[%s276_s26] sm:$0xff] }
  0x31   : > { %v489_v46 = vand.u32 4294901760, %v488_v33  ;;  %v495_v49 = vsub.f32 %v3357_v1, %v4474_v36  ;;  %v373_v53 = vand.u32 4294901760, %v314_v37  ;;  %v4471_v55 = vand.u32 4294901760, %v3378_v19  ;;  %4526 = vst [vmem:[#allocation6_spill] sm:$0xff] %v3444_v32 }
  0x32   : > { %2596 = vmatpush1.bf16.msra.mxu0 %v3344_v60  ;;  %2620 = vmatpush1.bf16.msra.mxu1 %v2619_v18  ;;  %v502_v52 = vsub.f32 %v3370_v7, %v4472_v42  ;;  %v4470_v58 = vand.u32 4294901760, %v3380_v25  ;;  %v376_v61 = vand.u32 4294901760, %v3412_v43  ;;  %v3435_v0 = vpack.c.bf16 %v361_v8, %v358_v62 }
  0x33   : > { %2597 = vmatprep.subr.bf16.mxu0 %v4480_v3  ;;  %2621 = vmatprep.subr.bf16.mxu1 %v4480_v3  ;;  %v2625_v2 = vpack.c.bf16 %v489_v46, %v482_v45  ;;  %v496_v4 = vand.u32 4294901760, %v495_v49  ;;  %v3438_v5 = vsub.f32 %v3386_v27, %v370_v50  ;;  %v509_v10 = vsub.f32 %v3378_v19, %v4471_v55 }
  0x34   : > { %v503_v6 = vand.u32 4294901760, %v502_v52  ;;  %v379_v11 = vand.u32 4294901760, %v316_v59  ;;  %v4473_v18 = vand.u32 4294901760, %v3403_v39  ;;  %v3447_v62 = vsub.f32 %v314_v37, %v373_v53 }
  0x35   : > { %v516_v8 = vsub.f32 %v3380_v25, %v4470_v58  ;;  %v529_v27 = vand.u32 4294901760, %v3406_v40  ;;  %v319_v33 = vsel %vm317_vm0, %v3433_v63, 0  ;;  %v3457_v45 = vpack.c.bf16 %v367_v26, %v364_v13 }
  0x36   : > { %2599 = vmatpush1.bf16.msra.mxu0 %v3390_v30  ;;  %2623 = vmatpush1.bf16.msra.mxu1 %v2622_v38  ;;  %v3460_v46 = vsub.f32 %v3412_v43, %v376_v61  ;;  %v523_v37 = vsub.f32 %v3403_v39, %v4473_v18  ;;  %v3466_v49 = vand.u32 4294901760, %v319_v33  ;;  %v3469_v52 = vand.u32 4294901760, %v3444_v32 }
  0x37   : > { %2600 = vmatprep.subr.bf16.mxu0 %v4480_v3  ;;  %2624 = vmatprep.subr.bf16.mxu1 %v4480_v3  ;;  %v530_v38 = vsub.f32 %v3406_v40, %v529_v27  ;;  %v2628_v58 = vpack.c.bf16 %v503_v6, %v496_v4  ;;  %v510_v55 = vand.u32 4294901760, %v509_v10  ;;  %v3471_v42 = vsub.f32 %v316_v59, %v379_v11 }
  0x38   : > { %v536_v13 = vand.u32 4294901760, %v3438_v5  ;;  %v517_v26 = vand.u32 4294901760, %v516_v8  ;;  %v3476_v43 = vsub.f32 %v319_v33, %v3466_v49  ;;  %v3480_v18 = vsub.f32 %v3444_v32, %v3469_v52  ;;  %586 = vmatprep.mubr.f32.mxu1 %v3466_v49 }
  0x39   : > { %v543_v36 = vand.u32 4294901760, %v3447_v62  ;;  %v3485_v59 = vpack.c.bf16 %v373_v53, %v370_v50  ;;  %v524_v4 = vand.u32 4294901760, %v523_v37  ;;  %v531_v6 = vand.u32 4294901760, %v530_v38 }
  0x3a   : > { %2602 = vmatpush1.bf16.msra.mxu0 %v3435_v0  ;;  %2626 = vmatpush1.bf16.msra.mxu1 %v2625_v2  ;;  %4527 = vst [vmem:[#allocation7_spill] sm:$0xff] %v3476_v43  ;;  %4528 = vst [vmem:[#allocation8_spill] sm:$0xff] %v3480_v18  ;;  %v3488_v2 = vand.u32 4294901760, %v3476_v43  ;;  %v3492_v10 = vand.u32 4294901760, %v3480_v18  ;;  %v537_v8 = vsub.f32 %v3438_v5, %v536_v13  ;;  %v550_v33 = vand.u32 4294901760, %v3460_v46 }
  0x3b   : > { %2603 = vmatprep.subr.bf16.mxu0 %v4480_v3  ;;  %2627 = vmatprep.subr.bf16.mxu1 %v4480_v3  ;;  %v557_v12 = vand.u32 4294901760, %v3471_v42  ;;  %v2631_v50 = vpack.c.bf16 %v517_v26, %v510_v55  ;;  %v544_v37 = vsub.f32 %v3447_v62, %v543_v36  ;;  %v3503_v38 = vpack.c.bf16 %v379_v11, %v376_v61 }
  0x3c   : > { %4529 = vst [vmem:[#allocation9_spill] sm:$0xff] %v3488_v2  ;;  %4530 = vst [vmem:[#allocation10_spill] sm:$0xff] %v3492_v10  ;;  %v408_v53 = vsub.f32 %v3476_v43, %v3488_v2  ;;  %v2634_v9 = vpack.c.bf16 %v531_v6, %v524_v4  ;;  %v414_v56 = vsub.f32 %v3480_v18, %v3492_v10  ;;  %v538_v51 = vand.u32 4294901760, %v537_v8 }
  0x3d   : > { %v551_v55 = vsub.f32 %v3460_v46, %v550_v33  ;;  %v545_v26 = vand.u32 4294901760, %v544_v37  ;;  %v3516_v61 = vpack.c.bf16 %v431_v24, %v424_v23  ;;  %v3522_v11 = vpack.c.bf16 %v445_v29, %v438_v28 }
  0x3e   : > { %2605 = vmatpush1.bf16.msra.mxu0 %v3457_v45  ;;  %2629 = vmatpush1.bf16.msra.mxu1 %v2628_v58  ;;  %v3505_v57 = vand.u32 4294901760, %v408_v53  ;;  %v558_v58 = vsub.f32 %v3471_v42, %v557_v12  ;;  %v4532_v4 = vand.u32 4294901760, %v3288_v31  ;;  %v4533_v8 = vand.u32 4294901760, %v3296_v34 }
  0x3f   : > { %2606 = vmatprep.subr.bf16.mxu0 %v4480_v3  ;;  %2630 = vmatprep.subr.bf16.mxu1 %v4480_v3  ;;  %v4534_v23 = vand.u32 4294901760, %v3298_v35  ;;  %v4536_v28 = vand.u32 4294901760, %v3328_v54  ;;  %v4537_v53 = vand.u32 4294901760, %v3357_v1  ;;  %v3565_v63 = vand.u32 4294901760, %v414_v56 }
  0x40   : > { %4531 = vst [vmem:[#allocation11_spill] sm:$0xff] %v3505_v57  ;;  %v3528_v6 = vpack.c.bf16 %v4532_v4, %v452_v48  ;;  %v4538_v48 = vand.u32 4294901760, %v3370_v7  ;;  %410 = vmatprep.mubr.f32.mxu0 %v3505_v57  ;;  %v4539_v4 = vand.u32 4294901760, %v3378_v19  ;;  %v552_v57 = vand.u32 4294901760, %v551_v55  ;;  %v2578_v55 = vld [vmem:[%s4465_s2] ss:$0 sm:$0xff] }
  0x41   : > { %v3536_v24 = vpack.c.bf16 %v4534_v23, %v4533_v8  ;;  %v4541_v23 = vand.u32 4294901760, %v3403_v39  ;;  %4542 = vst [vmem:[#allocation12_spill] sm:$0xff] %v3565_v63  ;;  %v2646_v56 = vpack.c.bf16 %v3275_v21, %v3265_v17  ;;  %v2655_v17 = vpack.c.bf16 %v3328_v54, %v3319_v47  ;;  %v3624_v54 = vld [vmem:[%s4467_s4 + $0x18] sm:$0xff] }
  0x42   : > { %2608 = vmatpush1.bf16.msra.mxu0 %v3485_v59  ;;  %2632 = vmatpush1.bf16.msra.mxu1 %v2631_v50  ;;  %v4535_v50 = vand.u32 4294901760, %v3319_v47  ;;  %v3548_v37 = vpack.c.bf16 %v4538_v48, %v4537_v53  ;;  %v2637_v53 = vpack.c.bf16 %v545_v26, %v538_v51  ;;  %v2643_v48 = vpack.c.bf16 %v3263_v16, %v3261_v15  ;;  %v3617_v51 = vld [vmem:[%s4467_s4 + $0x10] sm:$0xff]  ;;  %v3684_v26 = vld [vmem:[%s4467_s4 + $0x38] sm:$0xff] }
  0x43   : > { %2609 = vmatprep.subr.bf16.mxu0 %v4480_v3  ;;  %2633 = vmatprep.subr.bf16.mxu1 %v4480_v3  ;;  %v4540_v3 = vand.u32 4294901760, %v3380_v25  ;;  %v3559_v32 = vpack.c.bf16 %v529_v27, %v4541_v23  ;;  %v2649_v15 = vpack.c.bf16 %v3288_v31, %v3278_v22  ;;  %v2652_v16 = vpack.c.bf16 %v3298_v35, %v3296_v34  ;;  %v3602_v22 = vld [vmem:[%s4467_s4] sm:$0xff]  ;;  %v3607_v31 = vld [vmem:[%s4467_s4 + $0x8] sm:$0xff] }
  0x44   : > { %v3542_v29 = vpack.c.bf16 %v4536_v28, %v4535_v50  ;;  %v3561_v50 = vpack.c.bf16 %v543_v36, %v536_v13  ;;  %v3563_v28 = vpack.c.bf16 %v557_v12, %v550_v33  ;;  %v2658_v21 = vpack.c.bf16 %v3370_v7, %v3357_v1  ;;  %v3668_v33 = vld [vmem:[%s271_s20] sm:$0xff] }
  0x45   : > { %v3555_v8 = vpack.c.bf16 %v4540_v3, %v4539_v4  ;;  %v559_v3 = vand.u32 4294901760, %v558_v58  ;;  %v4543_v4 = vmov 0.0|0.0   ;;  %v2661_v34 = vpack.c.bf16 %v3380_v25, %v3378_v19  ;;  %v3639_v19 = vld [vmem:[%s4467_s4 + $0x28] sm:$0xff]  ;;  %4544 = vst [vmem:[#allocation13_spill] sm:$0xff] %v3668_v33  ;;  %v3679_v58 = vld [vmem:[%s4467_s4 + $0x30] sm:$0xff] }
  0x46   : > { %2611 = vmatpush1.bf16.msra.mxu0 %v3503_v38  ;;  %2635 = vmatpush1.bf16.msra.mxu1 %v2634_v9  ;;  %v4500_v35 = vand.u32 4294901760, %v3602_v22  ;;  %v4497_v47 = vand.u32 4294901760, %v3607_v31  ;;  %v2664_v1 = vpack.c.bf16 %v3406_v40, %v3403_v39  ;;  %v4489_v7 = vand.u32 4294901760, %v3624_v54  ;;  %v3634_v9 = vld [vmem:[%s4467_s4 + $0x20] sm:$0xff] }
  0x47   : > { %2636 = vmatprep.subr.bf16.mxu1 %v4543_v4  ;;  %2642 = vmatprep.subr.bf16.mxu0 %v4543_v4  ;;  %v2640_v12 = vpack.c.bf16 %v559_v3, %v552_v57  ;;  %v4492_v57 = vand.u32 4294901760, %v3617_v51  ;;  %v2667_v39 = vpack.c.bf16 %v3447_v62, %v3438_v5  ;;  %v4486_v40 = vand.u32 4294901760, %v3634_v9 }
  0x48   : > { %v3644_v25 = vsub.f32 %v3602_v22, %v4500_v35  ;;  %v3649_v36 = vsub.f32 %v3607_v31, %v4497_v47  ;;  %v4485_v27 = vand.u32 4294901760, %v3639_v19  ;;  %v3689_v23 = vsub.f32 %v3624_v54, %v4489_v7 }
  0x49   : > { %416 = vmatmul.mubr.f32.vlgmr.msra.gmra.mrb[0].mxu0 %v3565_v63  ;;  %v3666_v13 = vsub.f32 %v3617_v51, %v4492_v57  ;;  %vm293_vm1 = vcmask 97280   ;;  %vm2487_vm2 = vcmask 64512  }
  0x4a   : > { %2638 = vmatpush1.bf16.msra.mxu1 %v2637_v53  ;;  %2644 = vmatpush1.bf16.msra.mxu0 %v2643_v48  ;;  %v4494_v5 = vand.u32 4294901760, %v3644_v25  ;;  %v4493_v62 = vand.u32 4294901760, %v3649_v36  ;;  %v292_v53 = vmul.f32 %v2578_v55, %v3668_v33 }
  0x4b   : > { %2639 = vmatprep.subr.bf16.mxu1 %v4543_v4  ;;  %2645 = vmatprep.subr.bf16.mxu0 %v4543_v4 }
  0x4c   : > { %699 = vmatprep.mubr.f32.mxu0 %v3476_v43  ;;  %v294_v48 = vsel %vm293_vm1, %v292_v53, 0.0  ;;  %v3699_v3 = vpack.c.bf16 %v4493_v62, %v4494_v5  ;;  %v3741_v53 = vld [vmem:[%s4467_s4 + $0x50] sm:$0xff]  ;;  %v3777_v62 = vld [vmem:[%s4467_s4 + $0x60] sm:$0xff]  ;;  %v3782_v5 = vld [vmem:[%s4467_s4 + $0x68] sm:$0xff] }
  0x4d   : > { %295 = vadd.xlane.f32.xlu1 %v294_v48  ;;  %v3746_v48 = vld [vmem:[%s4467_s4 + $0x58] sm:$0xff]  ;;  %v4504_v7 = vand.u32 4294901760, %v3741_v53 }
  0x4e   : > { %2641 = vmatpush1.bf16.msra.mxu1 %v2640_v12  ;;  %2647 = vmatpush1.bf16.msra.mxu0 %v2646_v56  ;;  %4545 = vst [vmem:[#allocation14_spill] sm:$0xff] %v3699_v3  ;;  %v2670_v12 = vpack.c.bf16 %v3471_v42, %v3460_v46  ;;  %v4490_v56 = vand.u32 4294901760, %v3679_v58  ;;  %v3716_v42 = vld [vmem:[%s4467_s4 + $0x48] sm:$0xff]  ;;  %v3721_v46 = vsub.f32 %v3634_v9, %v4486_v40  ;;  %v3882_v3 = vld [vmem:[%s4467_s4 + $0x90] sm:$0xff] }
  0x4f   : > { %2648 = vmatprep.subr.bf16.mxu0 %v4543_v4  ;;  %2672 = vmatprep.subr.bf16.mxu1 %v4543_v4  ;;  %v4499_v55 = vand.u32 4294901760, %v3716_v42 }
  0x51   : > { %588 = vmatmul.mubr.f32.vlgmr.msra.gmra.mrb[0].mxu1 %v3469_v52 }
  0x52   : > { %2650 = vmatpush1.bf16.msra.mxu0 %v2649_v15  ;;  %2674 = vmatpush1.bf16.msra.mxu1 %v3259_v14  ;;  %v4491_v15 = vand.u32 4294901760, %v3684_v26 }
  0x53   : > { %2651 = vmatprep.subr.bf16.mxu0 %v4543_v4  ;;  %2675 = vmatprep.subr.bf16.mxu1 %v4543_v4 }
  0x54   : > { %794 = vmatprep.mubr.f32.mxu1 %v3488_v2  ;;  %v3756_v40 = vsub.f32 %v3684_v26, %v4491_v15 }
  0x56   : > { %2653 = vmatpush1.bf16.msra.mxu0 %v2652_v16  ;;  %2677 = vmatpush1.bf16.msra.mxu1 %v3273_v20  ;;  %v4488_v16 = vand.u32 4294901760, %v3666_v13  ;;  %v4501_v57 = vand.u32 4294901760, %v3756_v40 }
  0x57   : > { %2654 = vmatprep.subr.bf16.mxu0 %v4543_v4  ;;  %2678 = vmatprep.subr.bf16.mxu1 %v4543_v4 }
  0x5a   : > { %2656 = vmatpush1.bf16.msra.mxu0 %v2655_v17  ;;  %2680 = vmatpush1.bf16.msra.mxu1 %v3314_v41  ;;  %v4487_v17 = vand.u32 4294901760, %v3689_v23 }
  0x5b   : > { %2657 = vmatprep.subr.bf16.mxu0 %v4543_v4  ;;  %2681 = vmatprep.subr.bf16.mxu1 %v4543_v4 }
  0x5e   : > { %2659 = vmatpush1.bf16.msra.mxu0 %v2658_v21  ;;  %2683 = vmatpush1.bf16.msra.mxu1 %v3316_v44  ;;  %v3711_v21 = vld [vmem:[%s4467_s4 + $0x40] sm:$0xff] }
  0x5f   : > { %2660 = vmatprep.subr.bf16.mxu0 %v4543_v4  ;;  %2684 = vmatprep.subr.bf16.mxu1 %v4543_v4 }
  0x62   : > { %2662 = vmatpush1.bf16.msra.mxu0 %v2661_v34  ;;  %2686 = vmatpush1.bf16.msra.mxu1 %v3344_v60  ;;  %v3726_v34 = vsub.f32 %v3639_v19, %v4485_v27  ;;  %v3751_v27 = vsub.f32 %v3679_v58, %v4490_v56  ;;  %v3812_v56 = vld [vmem:[%s4467_s4 + $0x70] sm:$0xff] }
  0x63   : > { %2663 = vmatprep.subr.bf16.mxu0 %v4543_v4  ;;  %2687 = vmatprep.subr.bf16.mxu1 %v4543_v4 }
  0x66   : > { %2665 = vmatpush1.bf16.msra.mxu0 %v2664_v1  ;;  %2689 = vmatpush1.bf16.msra.mxu1 %v3390_v30  ;;  %v3734_v1 = vpack.c.bf16 %v4487_v17, %v4488_v16  ;;  %v4496_v17 = vand.u32 4294901760, %v3721_v46  ;;  %v4495_v16 = vand.u32 4294901760, %v3726_v34 }
  0x67   : > { %2666 = vmatprep.subr.bf16.mxu0 %v4543_v4  ;;  %2690 = vmatprep.subr.bf16.mxu1 %v4543_v4 }
  0x68   : > { %4546 = vst [vmem:[#allocation15_spill] sm:$0xff] %v3734_v1  ;;  %v3769_v15 = vpack.c.bf16 %v4495_v16, %v4496_v17  ;;  %v3792_v17 = vsub.f32 %v3716_v42, %v4499_v55  ;;  %v4549_v55 = vand.u32 4294901760, %v3746_v48  ;;  %v3847_v1 = vld [vmem:[%s4467_s4 + $0x80] sm:$0xff] }
  0x6a   : > { %2668 = vmatpush1.bf16.msra.mxu0 %v2667_v39  ;;  %2692 = vmatpush1.bf16.msra.mxu1 %v3435_v0  ;;  %v4498_v39 = vand.u32 4294901760, %v3711_v21  ;;  %4547 = vst [vmem:[#allocation16_spill] sm:$0xff] %v3769_v15 }
  0x6b   : > { %2669 = vmatprep.subr.bf16.mxu0 %v4543_v4  ;;  %2693 = vmatprep.subr.bf16.mxu1 %v4543_v4 }
  0x6c   : > { %v3787_v16 = vsub.f32 %v3711_v21, %v4498_v39  ;;  %v3827_v39 = vsub.f32 %v3746_v48, %v4549_v55 }
  0x6e   : > { %2671 = vmatpush1.bf16.msra.mxu0 %v2670_v12  ;;  %2695 = vmatpush1.bf16.msra.mxu1 %v3457_v45  ;;  %v4502_v12 = vand.u32 4294901760, %v3751_v27  ;;  %v4508_v35 = vand.u32 4294901760, %v3787_v16 }
  0x6f   : > { %2696 = vmatprep.subr.bf16.mxu1 %v4543_v4  ;;  %2702 = vmatprep.subr.bf16.mxu0 %v4543_v4 }
  0x70   : > { %v3802_v47 = vpack.c.bf16 %v4501_v57, %v4502_v12  ;;  %v3817_v57 = vld [vmem:[%s4467_s4 + $0x78] sm:$0xff]  ;;  %v3822_v12 = vsub.f32 %v3741_v53, %v4504_v7  ;;  %v4552_v7 = vand.u32 4294901760, %v3782_v5 }
  0x71   : > { %702 = vmatmul.mubr.f32.vlgmr.msra.gmra.mrb[2].mxu0 %v3480_v18 }
  0x72   : > { %2698 = vmatpush1.bf16.msra.mxu1 %v3485_v59  ;;  %2704 = vmatpush1.bf16.msra.mxu0 %v3516_v61  ;;  %4548 = vst [vmem:[#allocation17_spill] sm:$0xff] %v3802_v47  ;;  %v4507_v61 = vand.u32 4294901760, %v3792_v17  ;;  %v3862_v55 = vsub.f32 %v3782_v5, %v4552_v7  ;;  %v4557_v7 = vand.u32 4294901760, %v3817_v57 }
  0x73   : > { %2699 = vmatprep.subr.bf16.mxu1 %v4543_v4  ;;  %2705 = vmatprep.subr.bf16.mxu0 %v4543_v4 }
  0x74   : > { %928 = vmatprep.mubr.f32.mxu0 %v3466_v49  ;;  %v3837_v47 = vpack.c.bf16 %v4507_v61, %v4508_v35  ;;  %v3852_v61 = vld [vmem:[%s4467_s4 + $0x88] sm:$0xff]  ;;  %v4551_v35 = vand.u32 4294901760, %v3777_v62 }
  0x75   : > { %v4561_v43 = vand.u32 4294901760, %v3852_v61 }
  0x76   : > { %2701 = vmatpush1.bf16.msra.mxu1 %v3503_v38  ;;  %2707 = vmatpush1.bf16.msra.mxu0 %v3522_v11  ;;  %4550 = vst [vmem:[#allocation18_spill] sm:$0xff] %v3837_v47  ;;  %v3857_v15 = vsub.f32 %v3777_v62, %v4551_v35  ;;  %v4553_v11 = vand.u32 4294901760, %v3822_v12  ;;  %v4554_v47 = vand.u32 4294901760, %v3827_v39 }
  0x77   : > { %2708 = vmatprep.subr.bf16.mxu0 %v4543_v4  ;;  %2732 = vmatprep.subr.bf16.mxu1 %v4543_v4  ;;  %v3921_v63 = vsub.f32 %v3852_v61, %v4561_v43 }
  0x79   : > { %798 = vmatmul.mubr.f32.vlgmr.msra.gmra.mrb[2].mxu1 %v3492_v10  ;;  %v3872_v10 = vpack.c.bf16 %v4554_v47, %v4553_v11  ;;  %v3887_v47 = vld [vmem:[%s4467_s4 + $0x98] sm:$0xff]  ;;  %v4556_v11 = vand.u32 4294901760, %v3812_v56 }
  0x7a   : > { %2710 = vmatpush1.bf16.msra.mxu0 %v3528_v6  ;;  %2734 = vmatpush1.bf16.msra.mxu1 %v3259_v14  ;;  %v3897_v6 = vsub.f32 %v3817_v57, %v4557_v7  ;;  %v4558_v14 = vand.u32 4294901760, %v3857_v15  ;;  %v4523_v33 = vand.u32 4294901760, %v3887_v47 }
  0x7b   : > { %2711 = vmatprep.subr.bf16.mxu0 %v4543_v4  ;;  %2735 = vmatprep.subr.bf16.mxu1 %v4543_v4  ;;  %4555 = vst [vmem:[#allocation19_spill] sm:$0xff] %v3872_v10  ;;  %v3892_v35 = vsub.f32 %v3812_v56, %v4556_v11  ;;  %v4559_v10 = vand.u32 4294901760, %v3862_v55  ;;  %v4519_v11 = vand.u32 4294901760, %v3882_v3 }
  0x7c   : > { %1020 = vmatprep.mubr.f32.mxu1 %v3466_v49 }
  0x7d   : > { %v3907_v18 = vpack.c.bf16 %v4559_v10, %v4558_v14  ;;  %v1256_v7 = vand.u32 4294901760, %v3892_v35  ;;  %v3938_v43 = vsub.f32 %v3882_v3, %v4519_v11 }
  0x7e   : > { %2713 = vmatpush1.bf16.msra.mxu0 %v3536_v24  ;;  %2737 = vmatpush1.bf16.msra.mxu1 %v3273_v20  ;;  %v4520_v24 = vand.u32 4294901760, %v3897_v6  ;;  %v4560_v20 = vand.u32 4294901760, %v3847_v1 }
  0x7f   : > { %2714 = vmatprep.subr.bf16.mxu0 %v4543_v4  ;;  %2738 = vmatprep.subr.bf16.mxu1 %v4543_v4  ;;  %v4522_v11 = vand.u32 4294901760, %v3938_v43 }
  0x80   : > { %v3916_v2 = vsub.f32 %v3847_v1, %v4560_v20  ;;  %v3931_v10 = vpack.c.bf16 %v4520_v24, %v1256_v7  ;;  %v1277_v20 = vand.u32 4294901760, %v3921_v63 }
  0x82   : > { %2716 = vmatpush1.bf16.msra.mxu0 %v3542_v29  ;;  %2740 = vmatpush1.bf16.msra.mxu1 %v3314_v41  ;;  %v1270_v14 = vand.u32 4294901760, %v3916_v2  ;;  %v3943_v41 = vsub.f32 %v3887_v47, %v4523_v33 }
  0x83   : > { %2717 = vmatprep.subr.bf16.mxu0 %v4543_v4  ;;  %2741 = vmatprep.subr.bf16.mxu1 %v4543_v4 }
  0x84   : > { %v3953_v29 = vpack.c.bf16 %v1277_v20, %v1270_v14  ;;  %v4521_v24 = vand.u32 4294901760, %v3943_v41 }
  0x86   : > { %2719 = vmatpush1.bf16.msra.mxu0 %v3548_v37  ;;  %2743 = vmatpush1.bf16.msra.mxu1 %v3316_v44  ;;  %v3965_v44 = vpack.c.bf16 %v4521_v24, %v4522_v11  ;;  %v4564_v37 = vand.u32 4294901760, %v3644_v25 }
  0x87   : > { %2720 = vmatprep.subr.bf16.mxu0 %v4543_v4  ;;  %2744 = vmatprep.subr.bf16.mxu1 %v4543_v4 }
  0x8a   : > { %2722 = vmatpush1.bf16.msra.mxu0 %v3555_v8  ;;  %2746 = vmatpush1.bf16.msra.mxu1 %v3344_v60  ;;  %v4562_v60 = vand.u32 4294901760, %v3602_v22  ;;  %v1159_v8 = vsub.f32 %v3644_v25, %v4564_v37 }
  0x8b   : > { %2723 = vmatprep.subr.bf16.mxu0 %v4543_v4  ;;  %2747 = vmatprep.subr.bf16.mxu1 %v4543_v4 }
  0x8e   : > { %2725 = vmatpush1.bf16.msra.mxu0 %v3559_v32  ;;  %2749 = vmatpush1.bf16.msra.mxu1 %v3390_v30  ;;  %v4563_v30 = vand.u32 4294901760, %v3607_v31  ;;  %v1160_v31 = vand.u32 4294901760, %v1159_v8  ;;  %v4572_v8 = vand.u32 4294901760, %v3726_v34 }
  0x8f   : > { %2726 = vmatprep.subr.bf16.mxu0 %v4543_v4  ;;  %2750 = vmatprep.subr.bf16.mxu1 %v4543_v4 }
  0x90   : > { %v3981_v32 = vpack.c.bf16 %v4563_v30, %v4562_v60  ;;  %v4568_v30 = vand.u32 4294901760, %v3666_v13 }
  0x92   : > { %2728 = vmatpush1.bf16.msra.mxu0 %v3561_v50  ;;  %2752 = vmatpush1.bf16.msra.mxu1 %v3435_v0  ;;  %v4565_v0 = vand.u32 4294901760, %v3649_v36  ;;  %v1173_v37 = vsub.f32 %v3666_v13, %v4568_v30 }
  0x93   : > { %2729 = vmatprep.subr.bf16.mxu0 %v4543_v4  ;;  %2753 = vmatprep.subr.bf16.mxu1 %v4543_v4 }
  0x94   : > { %v1166_v50 = vsub.f32 %v3649_v36, %v4565_v0  ;;  %v4569_v0 = vand.u32 4294901760, %v3689_v23 }
  0x96   : > { %2731 = vmatpush1.bf16.msra.mxu0 %v3563_v28  ;;  %2755 = vmatpush1.bf16.msra.mxu1 %v3457_v45  ;;  %v4566_v45 = vand.u32 4294901760, %v3617_v51  ;;  %v4567_v28 = vand.u32 4294901760, %v3624_v54  ;;  %v1167_v60 = vand.u32 4294901760, %v1166_v50  ;;  %v1180_v24 = vsub.f32 %v3689_v23, %v4569_v0  ;;  %v4570_v51 = vld [vmem:[#allocation11_spill] sm:$0xff] }
  0x97   : > { %2756 = vmatprep.subr.bf16.mxu1 %v4543_v4  ;;  %2762 = vmatprep.subr.bf16.mxu0 %v4543_v4  ;;  %v1194_v50 = vsub.f32 %v3726_v34, %v4572_v8 }
  0x98   : > { %v3996_v22 = vpack.c.bf16 %v4567_v28, %v4566_v45  ;;  %v4573_v45 = vand.u32 4294901760, %v3634_v9  ;;  %v4574_v28 = vand.u32 4294901760, %v3639_v19  ;;  %v4023_v0 = vpack.c.bf16 %v1167_v60, %v1160_v31 }
  0x99   : > { %930 = vmatmul.mubr.f32.vlgmr.msra.gmra.mrb[4].mxu0 %v3469_v52  ;;  %v1181_v11 = vand.u32 4294901760, %v1180_v24  ;;  %v1195_v19 = vand.u32 4294901760, %v1194_v50  ;;  %v4577_v24 = vand.u32 4294901760, %v3751_v27 }
  0x9a   : > { %2758 = vmatpush1.bf16.msra.mxu1 %v3485_v59  ;;  %2764 = vmatpush1.bf16.msra.mxu0 %v3981_v32  ;;  %v4571_v59 = vand.u32 4294901760, %v3721_v46  ;;  %v4021_v30 = vpack.c.bf16 %v4574_v28, %v4573_v45 }
  0x9b   : > { %2759 = vmatprep.subr.bf16.mxu1 %v4543_v4  ;;  %2765 = vmatprep.subr.bf16.mxu0 %v4543_v4  ;;  %v1201_v60 = vsub.f32 %v3751_v27, %v4577_v24 }
  0x9c   : > { %1144 = vmatprep.mubr.f32.mxu0 %v4570_v51  ;;  %v1187_v54 = vsub.f32 %v3721_v46, %v4571_v59  ;;  %v1174_v51 = vand.u32 4294901760, %v1173_v37  ;;  %v4576_v59 = vand.u32 4294901760, %v3684_v26  ;;  %v4578_v37 = vand.u32 4294901760, %v3756_v40 }
  0x9d   : > { %v4579_v26 = vand.u32 4294901760, %v3711_v21  ;;  %v1202_v45 = vand.u32 4294901760, %v1201_v60  ;;  %v4585_v60 = vand.u32 4294901760, %v3741_v53 }
  0x9e   : > { %2761 = vmatpush1.bf16.msra.mxu1 %v3503_v38  ;;  %2767 = vmatpush1.bf16.msra.mxu0 %v3996_v22  ;;  %v4575_v38 = vand.u32 4294901760, %v3679_v58  ;;  %v1188_v9 = vand.u32 4294901760, %v1187_v54  ;;  %v4036_v31 = vpack.c.bf16 %v1181_v11, %v1174_v51  ;;  %v1208_v58 = vsub.f32 %v3756_v40, %v4578_v37 }
  0x9f   : > { %2768 = vmatprep.subr.bf16.mxu0 %v4543_v4  ;;  %2792 = vmatprep.subr.bf16.mxu1 %v4543_v4  ;;  %v4580_v54 = vand.u32 4294901760, %v3716_v42  ;;  %v4581_v51 = vand.u32 4294901760, %v3787_v16  ;;  %v4583_v42 = vand.u32 4294901760, %v3822_v12  ;;  %v4586_v37 = vand.u32 4294901760, %v3746_v48 }
  0xa0   : > { %v4032_v8 = vpack.c.bf16 %v4576_v59, %v4575_v38  ;;  %v4053_v50 = vpack.c.bf16 %v1195_v19, %v1188_v9  ;;  %v1209_v28 = vand.u32 4294901760, %v1208_v58  ;;  %v4582_v59 = vand.u32 4294901760, %v3792_v17 }
  0xa1   : > { %1022 = vmatmul.mubr.f32.vlgmr.msra.gmra.mrb[4].mxu1 %v3469_v52  ;;  %v4051_v11 = vpack.c.bf16 %v4580_v54, %v4579_v26  ;;  %v1215_v38 = vsub.f32 %v3787_v16, %v4581_v51  ;;  %v1229_v9 = vsub.f32 %v3822_v12, %v4583_v42  ;;  %v4584_v19 = vand.u32 4294901760, %v3827_v39 }
  0xa2   : > { %2770 = vmatpush1.bf16.msra.mxu0 %v4021_v30  ;;  %2794 = vmatpush1.bf16.msra.mxu1 %v4023_v0  ;;  %v1222_v21 = vsub.f32 %v3792_v17, %v4582_v59  ;;  %v4077_v58 = vpack.c.bf16 %v4586_v37, %v4585_v60  ;;  %v4079_v26 = vpack.c.bf16 %v1209_v28, %v1202_v45  ;;  %v4587_v59 = vand.u32 4294901760, %v3777_v62 }
  0xa3   : > { %2771 = vmatprep.subr.bf16.mxu0 %v4543_v4  ;;  %2795 = vmatprep.subr.bf16.mxu1 %v4543_v4  ;;  %v1236_v24 = vsub.f32 %v3827_v39, %v4584_v19  ;;  %v1216_v54 = vand.u32 4294901760, %v1215_v38  ;;  %v4588_v42 = vand.u32 4294901760, %v3782_v5  ;;  %v1230_v33 = vand.u32 4294901760, %v1229_v9 }
  0xa4   : > { %1320 = vmatprep.mubr.f32.mxu1 %v3466_v49  ;;  %v1223_v51 = vand.u32 4294901760, %v1222_v21  ;;  %v4589_v45 = vand.u32 4294901760, %v3857_v15  ;;  %v4590_v38 = vand.u32 4294901760, %v3862_v55  ;;  %v4591_v5 = vand.u32 4294901760, %v3812_v56 }
  0xa5   : > { %v4087_v19 = vpack.c.bf16 %v4588_v42, %v4587_v59  ;;  %v1237_v53 = vand.u32 4294901760, %v1236_v24  ;;  %v4592_v21 = vand.u32 4294901760, %v3817_v57  ;;  %v4594_v57 = vand.u32 4294901760, %v3847_v1 }
  0xa6   : > { %2773 = vmatpush1.bf16.msra.mxu0 %v4032_v8  ;;  %2797 = vmatpush1.bf16.msra.mxu1 %v4036_v31  ;;  %v4091_v48 = vpack.c.bf16 %v1223_v51, %v1216_v54  ;;  %v1243_v28 = vsub.f32 %v3857_v15, %v4589_v45  ;;  %v1250_v62 = vsub.f32 %v3862_v55, %v4590_v38  ;;  %v4593_v51 = vand.u32 4294901760, %v3897_v6 }
  0xa7   : > { %2774 = vmatprep.subr.bf16.mxu0 %v4543_v4  ;;  %2798 = vmatprep.subr.bf16.mxu1 %v4543_v4  ;;  %v4105_v9 = vpack.c.bf16 %v4592_v21, %v4591_v5  ;;  %v4107_v24 = vpack.c.bf16 %v1237_v53, %v1230_v33  ;;  %v1257_v54 = vsub.f32 %v3892_v35, %v1256_v7  ;;  %v4595_v33 = vand.u32 4294901760, %v3852_v61 }
  0xa8   : > { %v1244_v60 = vand.u32 4294901760, %v1243_v28  ;;  %v1251_v37 = vand.u32 4294901760, %v1250_v62  ;;  %v1264_v56 = vsub.f32 %v3897_v6, %v4593_v51  ;;  %v1271_v42 = vsub.f32 %v3916_v2, %v1270_v14 }
  0xa9   : > { %v4123_v59 = vpack.c.bf16 %v4595_v33, %v4594_v57  ;;  %v1258_v53 = vand.u32 4294901760, %v1257_v54  ;;  %v1278_v1 = vsub.f32 %v3921_v63, %v1277_v20  ;;  %v4596_v61 = vand.u32 4294901760, %v3882_v3 }
  0xaa   : > { %2776 = vmatpush1.bf16.msra.mxu0 %v4051_v11  ;;  %2800 = vmatpush1.bf16.msra.mxu1 %v4053_v50  ;;  %v4130_v7 = vpack.c.bf16 %v1251_v37, %v1244_v60  ;;  %v1265_v45 = vand.u32 4294901760, %v1264_v56  ;;  %v4597_v14 = vand.u32 4294901760, %v3887_v47  ;;  %v1272_v38 = vand.u32 4294901760, %v1271_v42  ;;  %v4600_v56 = vld [vmem:[#allocation12_spill] sm:$0xff]  ;;  %v4611_v42 = vld [vmem:[#allocation18_spill] sm:$0xff] }
  0xab   : > { %2777 = vmatprep.subr.bf16.mxu0 %v4543_v4  ;;  %2801 = vmatprep.subr.bf16.mxu1 %v4543_v4  ;;  %v1279_v5 = vand.u32 4294901760, %v1278_v1  ;;  %v4598_v20 = vand.u32 4294901760, %v3938_v43  ;;  %v4599_v60 = vand.u32 4294901760, %v3943_v41  ;;  %v4161_v37 = vpack.c.bf16 %v3649_v36, %v3644_v25  ;;  %v4601_v25 = vld [vmem:[#allocation7_spill] sm:$0xff] }
  0xac   : > { %v4141_v28 = vpack.c.bf16 %v4597_v14, %v4596_v61  ;;  %v4145_v62 = vpack.c.bf16 %v1265_v45, %v1258_v53  ;;  %v4172_v33 = vpack.c.bf16 %v3689_v23, %v3666_v13  ;;  %v4181_v36 = vpack.c.bf16 %v3726_v34, %v3721_v46  ;;  %v4602_v23 = vld [vmem:[#allocation9_spill] sm:$0xff]  ;;  %v4612_v53 = vld [vmem:[#allocation19_spill] sm:$0xff] }
  0xad   : > { %v1285_v21 = vsub.f32 %v3938_v43, %v4598_v20  ;;  %v1292_v3 = vsub.f32 %v3943_v41, %v4599_v60  ;;  %v4157_v47 = vpack.c.bf16 %v1279_v5, %v1272_v38  ;;  %v4190_v13 = vpack.c.bf16 %v3756_v40, %v3751_v27 }
  0xae   : > { %2779 = vmatpush1.bf16.msra.mxu0 %v4077_v58  ;;  %2803 = vmatpush1.bf16.msra.mxu1 %v4079_v26  ;;  %v4199_v46 = vpack.c.bf16 %v3792_v17, %v3787_v16  ;;  %v4207_v40 = vpack.c.bf16 %v3827_v39, %v3822_v12  ;;  %v4215_v27 = vpack.c.bf16 %v3862_v55, %v3857_v15  ;;  %v4603_v17 = vld [vmem:[#allocation13_spill] sm:$0xff]  ;;  %v4606_v12 = vld [vmem:[#allocation15_spill] sm:$0xff]  ;;  %v4607_v55 = vld [vmem:[#allocation10_spill] sm:$0xff] }
  0xaf   : > { %2780 = vmatprep.subr.bf16.mxu0 %v4543_v4  ;;  %2804 = vmatprep.subr.bf16.mxu1 %v4543_v4  ;;  %v1286_v54 = vand.u32 4294901760, %v1285_v21  ;;  %v1293_v51 = vand.u32 4294901760, %v1292_v3  ;;  %v4223_v16 = vpack.c.bf16 %v3897_v6, %v3892_v35  ;;  %v4231_v15 = vpack.c.bf16 %v3921_v63, %v3916_v2  ;;  %v4604_v63 = vld [vmem:[#allocation8_spill] sm:$0xff]  ;;  %v4605_v2 = vld [vmem:[#allocation14_spill] sm:$0xff]  ;;  %v4609_v6 = vld [vmem:[#allocation17_spill] sm:$0xff] }
  0xb0   : > { %v1048_v34 = vsel %vm293_vm1, %v4603_v17, 0.0  ;;  %v4241_v39 = vpack.c.bf16 %v3943_v41, %v3938_v43  ;;  %v4608_v35 = vld [vmem:[#allocation16_spill] sm:$0xff]  ;;  %v4610_v43 = vld [vmem:[#allocation5_spill] sm:$0xff] }
  0xb1   : > { %v4168_v57 = vpack.c.bf16 %v1293_v51, %v1286_v54  ;;  %1049 = vadd.xlane.f32.xlu0 %v1048_v34  ;;  %v1762_v41 = vmul.f32 %v4610_v43, %v4610_v43  ;;  %v2481_v34 = vstv %s1027_s8 }
  0xb2   : > { %2782 = vmatpush1.bf16.msra.mxu0 %v4087_v19  ;;  %2806 = vmatpush1.bf16.msra.mxu1 %v4091_v48 }
  0xb3   : > { %2783 = vmatprep.subr.bf16.mxu0 %v4543_v4  ;;  %2807 = vmatprep.subr.bf16.mxu1 %v4543_v4 }
  0xb6   : > { %2785 = vmatpush1.bf16.msra.mxu0 %v4105_v9  ;;  %2809 = vmatpush1.bf16.msra.mxu1 %v4107_v24 }
  0xb7   : > { %2786 = vmatprep.subr.bf16.mxu0 %v4543_v4  ;;  %2810 = vmatprep.subr.bf16.mxu1 %v4543_v4 }
  0xba   : > { %2788 = vmatpush1.bf16.msra.mxu0 %v4123_v59  ;;  %2812 = vmatpush1.bf16.msra.mxu1 %v4130_v7 }
  0xbb   : > { %2789 = vmatprep.subr.bf16.mxu0 %v4543_v4  ;;  %2813 = vmatprep.subr.bf16.mxu1 %v4543_v4 }
  0xbe   : > { %2791 = vmatpush1.bf16.msra.mxu0 %v4141_v28  ;;  %2815 = vmatpush1.bf16.msra.mxu1 %v4145_v62 }
  0xbf   : > { %2816 = vmatprep.subr.bf16.mxu1 %v4543_v4  ;;  %2822 = vmatprep.subr.bf16.mxu0 %v4543_v4 }
  0xc1   : > { %1150 = vmatmul.mubr.f32.vlgmr.msra.gmra.mrb[6].mxu0 %v4600_v56 }
  0xc2   : > { %2818 = vmatpush1.bf16.msra.mxu1 %v4157_v47  ;;  %2824 = vmatpush1.bf16.msra.mxu0 %v4161_v37 }
  0xc3   : > { %2819 = vmatprep.subr.bf16.mxu1 %v4543_v4  ;;  %2825 = vmatprep.subr.bf16.mxu0 %v4543_v4 }
  0xc4   : > { %1433 = vmatprep.mubr.f32.mxu0 %v4601_v25 }
  0xc6   : > { %2821 = vmatpush1.bf16.msra.mxu1 %v4168_v57  ;;  %2827 = vmatpush1.bf16.msra.mxu0 %v4172_v33 }
  0xc7   : > { %2828 = vmatprep.subr.bf16.mxu0 %v4543_v4  ;;  %2852 = vmatprep.subr.bf16.mxu1 %v4543_v4 }
  0xc9   : > { %1322 = vmatmul.mubr.f32.vlgmr.msra.gmra.mrb[6].mxu1 %v3469_v52 }
  0xca   : > { %2830 = vmatpush1.bf16.msra.mxu0 %v4181_v36  ;;  %2854 = vmatpush1.bf16.msra.mxu1 %v3981_v32 }
  0xcb   : > { %2831 = vmatprep.subr.bf16.mxu0 %v4543_v4  ;;  %2855 = vmatprep.subr.bf16.mxu1 %v4543_v4 }
  0xcc   : > { %1528 = vmatprep.mubr.f32.mxu1 %v4602_v23 }
  0xce   : > { %2833 = vmatpush1.bf16.msra.mxu0 %v4190_v13  ;;  %2857 = vmatpush1.bf16.msra.mxu1 %v3996_v22 }
  0xcf   : > { %2834 = vmatprep.subr.bf16.mxu0 %v4543_v4  ;;  %2858 = vmatprep.subr.bf16.mxu1 %v4543_v4 }
  0xd2   : > { %2836 = vmatpush1.bf16.msra.mxu0 %v4199_v46  ;;  %2860 = vmatpush1.bf16.msra.mxu1 %v4021_v30 }
  0xd3   : > { %2837 = vmatprep.subr.bf16.mxu0 %v4543_v4  ;;  %2861 = vmatprep.subr.bf16.mxu1 %v4543_v4 }
  0xd6   : > { %2839 = vmatpush1.bf16.msra.mxu0 %v4207_v40  ;;  %2863 = vmatpush1.bf16.msra.mxu1 %v4032_v8 }
  0xd7   : > { %2840 = vmatprep.subr.bf16.mxu0 %v4543_v4  ;;  %2864 = vmatprep.subr.bf16.mxu1 %v4543_v4 }
  0xda   : > { %2842 = vmatpush1.bf16.msra.mxu0 %v4215_v27  ;;  %2866 = vmatpush1.bf16.msra.mxu1 %v4051_v11 }
  0xdb   : > { %2843 = vmatprep.subr.bf16.mxu0 %v4543_v4  ;;  %2867 = vmatprep.subr.bf16.mxu1 %v4543_v4 }
  0xde   : > { %2845 = vmatpush1.bf16.msra.mxu0 %v4223_v16  ;;  %2869 = vmatpush1.bf16.msra.mxu1 %v4077_v58 }
  0xdf   : > { %2846 = vmatprep.subr.bf16.mxu0 %v4543_v4  ;;  %2870 = vmatprep.subr.bf16.mxu1 %v4543_v4 }
  0xe2   : > { %2848 = vmatpush1.bf16.msra.mxu0 %v4231_v15  ;;  %2872 = vmatpush1.bf16.msra.mxu1 %v4087_v19 }
  0xe3   : > { %2849 = vmatprep.subr.bf16.mxu0 %v4543_v4  ;;  %2873 = vmatprep.subr.bf16.mxu1 %v4543_v4 }
  0xe6   : > { %2851 = vmatpush1.bf16.msra.mxu0 %v4241_v39  ;;  %2875 = vmatpush1.bf16.msra.mxu1 %v4105_v9 }
  0xe7   : > { %2876 = vmatprep.subr.bf16.mxu1 %v4543_v4  ;;  %2882 = vmatprep.subr.bf16.mxu0 %v4543_v4 }
  0xe9   : > { %1436 = vmatmul.mubr.f32.vlgmr.msra.gmra.mrb[8].mxu0 %v4604_v63 }
  0xea   : > { %2878 = vmatpush1.bf16.msra.mxu1 %v4123_v59  ;;  %2884 = vmatpush1.bf16.msra.mxu0 %v4605_v2 }
  0xeb   : > { %2879 = vmatprep.subr.bf16.mxu1 %v4543_v4  ;;  %2885 = vmatprep.subr.bf16.mxu0 %v4543_v4 }
  0xec   : > { %1662 = vmatprep.mubr.f32.mxu0 %v3466_v49 }
  0xee   : > { %2881 = vmatpush1.bf16.msra.mxu1 %v4141_v28  ;;  %2887 = vmatpush1.bf16.msra.mxu0 %v4606_v12 }
  0xef   : > { %2888 = vmatprep.subr.bf16.mxu0 %v4543_v4  ;;  %2912 = vmatprep.subr.bf16.mxu1 %v4543_v4 }
  0xf1   : > { %1532 = vmatmul.mubr.f32.vlgmr.msra.gmra.mrb[8].mxu1 %v4607_v55 }
  0xf2   : > { %2890 = vmatpush1.bf16.msra.mxu0 %v4608_v35  ;;  %2914 = vmatpush1.bf16.msra.mxu1 %v3981_v32 }
  0xf3   : > { %2891 = vmatprep.subr.bf16.mxu0 %v4543_v4  ;;  %2915 = vmatprep.subr.bf16.mxu1 %v4543_v4 }
  0xf4   : > { %1754 = vmatprep.mubr.f32.mxu1 %v3466_v49  ;;  %v1764_v49 = vsel %vm317_vm0, %v1762_v41, 0 }
  0xf5   : > { %v4280_v45 = vand.u32 4294901760, %v1764_v49 }
  0xf6   : > { %2893 = vmatpush1.bf16.msra.mxu0 %v4609_v6  ;;  %2917 = vmatpush1.bf16.msra.mxu1 %v3996_v22 }
  0xf7   : > { %2894 = vmatprep.subr.bf16.mxu0 %v4543_v4  ;;  %2918 = vmatprep.subr.bf16.mxu1 %v4543_v4  ;;  %v4287_v1 = vsub.f32 %v1764_v49, %v4280_v45 }
  0xf9   : > { %v1852_v61 = vand.u32 4294901760, %v4287_v1 }
  0xfa   : > { %2896 = vmatpush1.bf16.msra.mxu0 %v4611_v42  ;;  %2920 = vmatpush1.bf16.msra.mxu1 %v4021_v30 }
  0xfb   : > { %2897 = vmatprep.subr.bf16.mxu0 %v4543_v4  ;;  %2921 = vmatprep.subr.bf16.mxu1 %v4543_v4  ;;  %v1853_v14 = vsub.f32 %v4287_v1, %v1852_v61 }
  0xfd   : > { %v1854_v38 = vand.u32 4294901760, %v1853_v14 }
  0xfe   : > { %2899 = vmatpush1.bf16.msra.mxu0 %v4612_v53  ;;  %2923 = vmatpush1.bf16.msra.mxu1 %v4032_v8 }
  0xff   : > { %2900 = vmatprep.subr.bf16.mxu0 %v4543_v4  ;;  %2924 = vmatprep.subr.bf16.mxu1 %v4543_v4 }
 0x102   : > { %2902 = vmatpush1.bf16.msra.mxu0 %v3907_v18  ;;  %2926 = vmatpush1.bf16.msra.mxu1 %v4051_v11 }
 0x103   : > { %2903 = vmatprep.subr.bf16.mxu0 %v4543_v4  ;;  %2927 = vmatprep.subr.bf16.mxu1 %v4543_v4 }
 0x106   : > { %2905 = vmatpush1.bf16.msra.mxu0 %v3931_v10  ;;  %2929 = vmatpush1.bf16.msra.mxu1 %v4077_v58 }
 0x107   : > { %2906 = vmatprep.subr.bf16.mxu0 %v4543_v4  ;;  %2930 = vmatprep.subr.bf16.mxu1 %v4543_v4 }
 0x10a   : > { %2908 = vmatpush1.bf16.msra.mxu0 %v3953_v29  ;;  %2932 = vmatpush1.bf16.msra.mxu1 %v4087_v19 }
 0x10b   : > { %2909 = vmatprep.subr.bf16.mxu0 %v4543_v4  ;;  %2933 = vmatprep.subr.bf16.mxu1 %v4543_v4 }
 0x10e   : > { %2911 = vmatpush1.bf16.msra.mxu0 %v3965_v44  ;;  %2935 = vmatpush1.bf16.msra.mxu1 %v4105_v9 }
 0x10f   : > { %2936 = vmatprep.subr.bf16.mxu1 %v4543_v4  ;;  %2942 = vmatprep.subr.bf16.mxu0 %v4543_v4 }
 0x111   : > { %1664 = vmatmul.mubr.f32.vlgmr.msra.gmra.mrb[10].mxu0 %v3469_v52 }
 0x112   : > { %2938 = vmatpush1.bf16.msra.mxu1 %v4123_v59  ;;  %2944 = vmatpush1.bf16.msra.mxu0 %v3981_v32 }
 0x113   : > { %2939 = vmatprep.subr.bf16.mxu1 %v4543_v4  ;;  %2945 = vmatprep.subr.bf16.mxu0 %v4543_v4 }
 0x114   : > { %1855 = vmatprep.mubr.f32.mxu0 %v1854_v38 }
 0x116   : > { %2941 = vmatpush1.bf16.msra.mxu1 %v4141_v28  ;;  %2947 = vmatpush1.bf16.msra.mxu0 %v3996_v22 }
 0x117   : > { %2948 = vmatprep.subr.bf16.mxu0 %v4543_v4  ;;  %2972 = vmatprep.subr.bf16.mxu1 %v4543_v4 }
 0x119   : > { %1756 = vmatmul.mubr.f32.vlgmr.msra.gmra.mrb[10].mxu1 %v3469_v52  ;;  %v4613_v52 = vld [vmem:[#allocation6_spill] sm:$0xff] }
 0x11a   : > { %2950 = vmatpush1.bf16.msra.mxu0 %v4021_v30  ;;  %2974 = vmatpush1.bf16.msra.mxu1 %v4023_v0  ;;  %v1761_v21 = vmul.f32 %v4613_v52, %v4613_v52 }
 0x11b   : > { %2951 = vmatprep.subr.bf16.mxu0 %v4543_v4  ;;  %2975 = vmatprep.subr.bf16.mxu1 %v4543_v4 }
 0x11c   : > { %v417_v5 = vpop.f32.mrb[0].mxu0  ;;  %2031 = vmatprep.mubr.f32.mxu1 %v4280_v45  ;;  %v4330_v54 = vand.u32 4294901760, %v1761_v21 }
 0x11d   : > { %v419_v20 = vpop.f32.mrb[1].mxu0 }
 0x11e   : > { %2953 = vmatpush1.bf16.msra.mxu0 %v4032_v8  ;;  %2977 = vmatpush1.bf16.msra.mxu1 %v4036_v31  ;;  %v4337_v31 = vsub.f32 %v1761_v21, %v4330_v54 }
 0x11f   : > { %2954 = vmatprep.subr.bf16.mxu0 %v4543_v4  ;;  %2978 = vmatprep.subr.bf16.mxu1 %v4543_v4 }
 0x122   : > { %2956 = vmatpush1.bf16.msra.mxu0 %v4051_v11  ;;  %2980 = vmatpush1.bf16.msra.mxu1 %v4053_v50  ;;  %v1858_v50 = vand.u32 4294901760, %v4337_v31 }
 0x123   : > { %2957 = vmatprep.subr.bf16.mxu0 %v4543_v4  ;;  %2981 = vmatprep.subr.bf16.mxu1 %v4543_v4 }
 0x124   : > { %v589_v0 = vpop.f32.mrb[0].mxu1 }
 0x125   : > { %v590_v60 = vadd.f32 %v589_v0, %v417_v5  ;;  %v591_v3 = vpop.f32.mrb[1].mxu1 }
 0x126   : > { %2959 = vmatpush1.bf16.msra.mxu0 %v4077_v58  ;;  %2983 = vmatpush1.bf16.msra.mxu1 %v4079_v26  ;;  %v1859_v26 = vsub.f32 %v4337_v31, %v1858_v50 }
 0x127   : > { %2960 = vmatprep.subr.bf16.mxu0 %v4543_v4  ;;  %2984 = vmatprep.subr.bf16.mxu1 %v4543_v4 }
 0x12a   : > { %2962 = vmatpush1.bf16.msra.mxu0 %v4087_v19  ;;  %2986 = vmatpush1.bf16.msra.mxu1 %v4091_v48  ;;  %v1860_v48 = vand.u32 4294901760, %v1859_v26 }
 0x12b   : > { %2963 = vmatprep.subr.bf16.mxu0 %v4543_v4  ;;  %2987 = vmatprep.subr.bf16.mxu1 %v4543_v4 }
 0x12e   : > { %2965 = vmatpush1.bf16.msra.mxu0 %v4105_v9  ;;  %2989 = vmatpush1.bf16.msra.mxu1 %v4107_v24 }
 0x12f   : > { %2966 = vmatprep.subr.bf16.mxu0 %v4543_v4  ;;  %2990 = vmatprep.subr.bf16.mxu1 %v4543_v4 }
 0x132   : > { %2968 = vmatpush1.bf16.msra.mxu0 %v4123_v59  ;;  %2992 = vmatpush1.bf16.msra.mxu1 %v4130_v7 }
 0x133   : > { %2969 = vmatprep.subr.bf16.mxu0 %v4543_v4  ;;  %2993 = vmatprep.subr.bf16.mxu1 %v4543_v4 }
 0x136   : > { %2971 = vmatpush1.bf16.msra.mxu0 %v4141_v28  ;;  %2995 = vmatpush1.bf16.msra.mxu1 %v4145_v62 }
 0x137   : > { %2996 = vmatprep.subr.bf16.mxu1 %v4543_v4  ;;  %3002 = vmatprep.subr.bf16.mxu0 %v4543_v4 }
 0x139   : > { %1861 = vmatmul.mubr.f32.vlgmr.msra.gmra.mrb[12].mxu0 %v1860_v48  ;;  %v2485_v48 = vstv %s2577_s9 }
 0x13a   : > { %2998 = vmatpush1.bf16.msra.mxu1 %v4157_v47  ;;  %3004 = vmatpush1.bf16.msra.mxu0 %v4161_v37  ;;  %v1051_v47 = vmul.f32 %v4603_v17, %v4603_v17  ;;  %v296_v17 = vpop.xlane.xlu1 %295 }
 0x13b   : > { %2999 = vmatprep.subr.bf16.mxu1 %v4543_v4  ;;  %3005 = vmatprep.subr.bf16.mxu0 %v4543_v4 }
 0x13c   : > { %2144 = vmatprep.mubr.f32.mxu0 %v4287_v1  ;;  %v1052_v37 = vsel %vm293_vm1, %v1051_v47, 0.0 }
 0x13d   : > { %1053 = vadd.xlane.f32.xlu0 %v1052_v37 }
 0x13e   : > { %3001 = vmatpush1.bf16.msra.mxu1 %v4168_v57  ;;  %3007 = vmatpush1.bf16.msra.mxu0 %v4172_v33 }
 0x13f   : > { %3008 = vmatprep.subr.bf16.mxu0 %v4543_v4  ;;  %3032 = vmatprep.subr.bf16.mxu1 %v4543_v4 }
 0x141   : > { %2033 = vmatmul.mubr.f32.vlgmr.msra.gmra.mrb[12].mxu1 %v4330_v54 }
 0x142   : > { %3010 = vmatpush1.bf16.msra.mxu0 %v4181_v36  ;;  %3034 = vmatpush1.bf16.msra.mxu1 %v3981_v32 }
 0x143   : > { %3011 = vmatprep.subr.bf16.mxu0 %v4543_v4  ;;  %3035 = vmatprep.subr.bf16.mxu1 %v4543_v4 }
 0x144   : > { %v703_v24 = vpop.f32.mrb[2].mxu0  ;;  %2239 = vmatprep.mubr.f32.mxu1 %v1852_v61 }
 0x145   : > { %v704_v7 = vadd.f32 %v703_v24, %v590_v60  ;;  %v705_v62 = vpop.f32.mrb[3].mxu0 }
 0x146   : > { %3013 = vmatpush1.bf16.msra.mxu0 %v4190_v13  ;;  %3037 = vmatpush1.bf16.msra.mxu1 %v3996_v22 }
 0x147   : > { %3014 = vmatprep.subr.bf16.mxu0 %v4543_v4  ;;  %3038 = vmatprep.subr.bf16.mxu1 %v4543_v4 }
 0x14a   : > { %3016 = vmatpush1.bf16.msra.mxu0 %v4199_v46  ;;  %3040 = vmatpush1.bf16.msra.mxu1 %v4021_v30 }
 0x14b   : > { %3017 = vmatprep.subr.bf16.mxu0 %v4543_v4  ;;  %3041 = vmatprep.subr.bf16.mxu1 %v4543_v4 }
 0x14c   : > { %v799_v51 = vpop.f32.mrb[2].mxu1 }
 0x14d   : > { %v800_v56 = vadd.f32 %v799_v51, %v704_v7  ;;  %v801_v57 = vpop.f32.mrb[3].mxu1 }
 0x14e   : > { %3019 = vmatpush1.bf16.msra.mxu0 %v4207_v40  ;;  %3043 = vmatpush1.bf16.msra.mxu1 %v4032_v8 }
 0x14f   : > { %3020 = vmatprep.subr.bf16.mxu0 %v4543_v4  ;;  %3044 = vmatprep.subr.bf16.mxu1 %v4543_v4 }
 0x152   : > { %3022 = vmatpush1.bf16.msra.mxu0 %v4215_v27  ;;  %3046 = vmatpush1.bf16.msra.mxu1 %v4051_v11  ;;  %v1050_v27 = vpop.xlane.xlu0 %1049 }
 0x153   : > { %3023 = vmatprep.subr.bf16.mxu0 %v4543_v4  ;;  %3047 = vmatprep.subr.bf16.mxu1 %v4543_v4 }
 0x156   : > { %3025 = vmatpush1.bf16.msra.mxu0 %v4223_v16  ;;  %3049 = vmatpush1.bf16.msra.mxu1 %v4077_v58 }
 0x157   : > { %3026 = vmatprep.subr.bf16.mxu0 %v4543_v4  ;;  %3050 = vmatprep.subr.bf16.mxu1 %v4543_v4 }
 0x15a   : > { %3028 = vmatpush1.bf16.msra.mxu0 %v4231_v15  ;;  %3052 = vmatpush1.bf16.msra.mxu1 %v4087_v19 }
 0x15b   : > { %3029 = vmatprep.subr.bf16.mxu0 %v4543_v4  ;;  %3053 = vmatprep.subr.bf16.mxu1 %v4543_v4 }
 0x15e   : > { %3031 = vmatpush1.bf16.msra.mxu0 %v4241_v39  ;;  %3055 = vmatpush1.bf16.msra.mxu1 %v4105_v9 }
 0x15f   : > { %3056 = vmatprep.subr.bf16.mxu1 %v4543_v4  ;;  %3062 = vmatprep.subr.bf16.mxu0 %v4543_v4 }
 0x161   : > { %2147 = vmatmul.mubr.f32.vlgmr.msra.gmra.mrb[14].mxu0 %v4337_v31 }
 0x162   : > { %3058 = vmatpush1.bf16.msra.mxu1 %v4123_v59  ;;  %3064 = vmatpush1.bf16.msra.mxu0 %v4605_v2 }
 0x163   : > { %3059 = vmatprep.subr.bf16.mxu1 %v4543_v4  ;;  %3065 = vmatprep.subr.bf16.mxu0 %v4543_v4 }
 0x164   : > { %2373 = vmatprep.mubr.f32.mxu0 %v4280_v45 }
 0x166   : > { %3061 = vmatpush1.bf16.msra.mxu1 %v4141_v28  ;;  %3067 = vmatpush1.bf16.msra.mxu0 %v4606_v12 }
 0x167   : > { %3068 = vmatprep.subr.bf16.mxu0 %v4543_v4  ;;  %3092 = vmatprep.subr.bf16.mxu1 %v4543_v4 }
 0x169   : > { %2243 = vmatmul.mubr.f32.vlgmr.msra.gmra.mrb[14].mxu1 %v1858_v50 }
 0x16a   : > { %3070 = vmatpush1.bf16.msra.mxu0 %v4608_v35  ;;  %3094 = vmatpush1.bf16.msra.mxu1 %v3981_v32 }
 0x16b   : > { %3071 = vmatprep.subr.bf16.mxu0 %v4543_v4  ;;  %3095 = vmatprep.subr.bf16.mxu1 %v4543_v4 }
 0x16c   : > { %v931_v33 = vpop.f32.mrb[4].mxu0  ;;  %2465 = vmatprep.mubr.f32.mxu1 %v4280_v45 }
 0x16d   : > { %v932_v25 = vadd.f32 %v931_v33, %v800_v56  ;;  %v933_v36 = vpop.f32.mrb[5].mxu0 }
 0x16e   : > { %3073 = vmatpush1.bf16.msra.mxu0 %v4609_v6  ;;  %3097 = vmatpush1.bf16.msra.mxu1 %v3996_v22 }
 0x16f   : > { %3074 = vmatprep.subr.bf16.mxu0 %v4543_v4  ;;  %3098 = vmatprep.subr.bf16.mxu1 %v4543_v4 }
 0x172   : > { %3076 = vmatpush1.bf16.msra.mxu0 %v4611_v42  ;;  %3100 = vmatpush1.bf16.msra.mxu1 %v4021_v30 }
 0x173   : > { %3077 = vmatprep.subr.bf16.mxu0 %v4543_v4  ;;  %3101 = vmatprep.subr.bf16.mxu1 %v4543_v4 }
 0x174   : > { %v1023_v32 = vpop.f32.mrb[4].mxu1 }
 0x175   : > { %v1024_v13 = vadd.f32 %v1023_v32, %v932_v25  ;;  %v1025_v23 = vpop.f32.mrb[5].mxu1 }
 0x176   : > { %3079 = vmatpush1.bf16.msra.mxu0 %v4612_v53  ;;  %3103 = vmatpush1.bf16.msra.mxu1 %v4032_v8 }
 0x177   : > { %3080 = vmatprep.subr.bf16.mxu0 %v4543_v4  ;;  %3104 = vmatprep.subr.bf16.mxu1 %v4543_v4  ;;  %v2480_v63 = vadd.f32 %v1024_v13, %v296_v17 }
 0x17a   : > { %3082 = vmatpush1.bf16.msra.mxu0 %v3907_v18  ;;  %3106 = vmatpush1.bf16.msra.mxu1 %v4051_v11 }
 0x17b   : > { %3083 = vmatprep.subr.bf16.mxu0 %v4543_v4  ;;  %3107 = vmatprep.subr.bf16.mxu1 %v4543_v4 }
 0x17e   : > { %3085 = vmatpush1.bf16.msra.mxu0 %v3931_v10  ;;  %3109 = vmatpush1.bf16.msra.mxu1 %v4077_v58 }
 0x17f   : > { %3086 = vmatprep.subr.bf16.mxu0 %v4543_v4  ;;  %3110 = vmatprep.subr.bf16.mxu1 %v4543_v4 }
 0x182   : > { %3088 = vmatpush1.bf16.msra.mxu0 %v3953_v29  ;;  %3112 = vmatpush1.bf16.msra.mxu1 %v4087_v19 }
 0x183   : > { %3089 = vmatprep.subr.bf16.mxu0 %v4543_v4  ;;  %3113 = vmatprep.subr.bf16.mxu1 %v4543_v4 }
 0x186   : > { %3091 = vmatpush1.bf16.msra.mxu0 %v3965_v44  ;;  %3115 = vmatpush1.bf16.msra.mxu1 %v4105_v9 }
 0x187   : > { %3116 = vmatprep.subr.bf16.mxu1 %v4543_v4 }
 0x189   : > { %2375 = vmatmul.mubr.f32.vlgmr.msra.gmra.mrb[16].mxu0 %v4330_v54 }
 0x18a   : > { %3118 = vmatpush1.bf16.msra.mxu1 %v4123_v59 }
 0x18b   : > { %3119 = vmatprep.subr.bf16.mxu1 %v4543_v4 }
 0x18e   : > { %3121 = vmatpush1.bf16.msra.mxu1 %v4141_v28 }
 0x191   : > { %2467 = vmatmul.mubr.f32.vlgmr.msra.gmra.mrb[16].mxu1 %v4330_v54 }
 0x194   : > { %v1151_v18 = vpop.f32.mrb[6].mxu0 }
 0x195   : > { %v1153_v10 = vpop.f32.mrb[7].mxu0 }
 0x19c   : > { %v1323_v29 = vpop.f32.mrb[6].mxu1 }
 0x19d   : > { %v1324_v22 = vadd.f32 %v1323_v29, %v1151_v18  ;;  %v1325_v30 = vpop.f32.mrb[7].mxu1 }
 0x1bc   : > { %v1437_v44 = vpop.f32.mrb[8].mxu0 }
 0x1bd   : > { %v1438_v8 = vadd.f32 %v1437_v44, %v1324_v22  ;;  %v1439_v11 = vpop.f32.mrb[9].mxu0 }
 0x1c4   : > { %v1533_v58 = vpop.f32.mrb[8].mxu1 }
 0x1c5   : > { %v1534_v19 = vadd.f32 %v1533_v58, %v1438_v8  ;;  %v1535_v9 = vpop.f32.mrb[9].mxu1 }
 0x1ca   : > { %v1054_v52 = vpop.xlane.xlu0 %1053 }
 0x1e4   : > { %v1665_v46 = vpop.f32.mrb[10].mxu0 }
 0x1e5   : > { %v1666_v40 = vadd.f32 %v1665_v46, %v1534_v19  ;;  %v1667_v59 = vpop.f32.mrb[11].mxu0 }
 0x1ec   : > { %v1757_v4 = vpop.f32.mrb[10].mxu1 }
 0x1ed   : > { %v1758_v28 = vadd.f32 %v1757_v4, %v1666_v40  ;;  %v1759_v16 = vpop.f32.mrb[11].mxu1 }
 0x1ef   : > { %v2472_v15 = vadd.f32 %v1758_v28, %v1050_v27 }
 0x1f1   : > { %v2473_v39 = vmul.f32 0.03125, %v2472_v15 }
 0x1f3   : > { %v2482_v2 = vmul.f32 %v2481_v34, %v2473_v39  ;;  %v2476_v3 = vmul.f32 %v2473_v39, %v2473_v39 }
 0x1f5   : > { %v2483_v12 = vsub.f32 %v2480_v63, %v2482_v2 }
 0x20c   : > { %v1862_v55 = vpop.f32.mrb[12].mxu0 }
 0x20d   : > { %v1864_v35 = vpop.f32.mrb[13].mxu0 }
 0x214   : > { %v2034_v6 = vpop.f32.mrb[12].mxu1 }
 0x215   : > { %v2035_v43 = vadd.f32 %v2034_v6, %v1862_v55  ;;  %v2036_v41 = vpop.f32.mrb[13].mxu1 }
 0x234   : > { %v2148_v42 = vpop.f32.mrb[14].mxu0 }
 0x235   : > { %v2149_v49 = vadd.f32 %v2148_v42, %v2035_v43  ;;  %v2150_v53 = vpop.f32.mrb[15].mxu0 }
 0x23c   : > { %v2244_v45 = vpop.f32.mrb[14].mxu1 }
 0x23d   : > { %v2245_v1 = vadd.f32 %v2244_v45, %v2149_v49  ;;  %v2246_v61 = vpop.f32.mrb[15].mxu1 }
 0x25c   : > { %v2376_v14 = vpop.f32.mrb[16].mxu0 }
 0x25d   : > { %v2377_v38 = vadd.f32 %v2376_v14, %v2245_v1  ;;  %v2378_v5 = vpop.f32.mrb[17].mxu0 }
 0x264   : > { %v2468_v20 = vpop.f32.mrb[16].mxu1 }
 0x265   : > { %v2469_v21 = vadd.f32 %v2468_v20, %v2377_v38  ;;  %v2470_v0 = vpop.f32.mrb[17].mxu1 }
 0x267   : > { %v2474_v60 = vadd.f32 %v2469_v21, %v1054_v52 }
 0x269   : > { %v2475_v54 = vmul.f32 0.03125, %v2474_v60 }
 0x26b   : > { %v2477_v31 = vsub.f32 %v2475_v54, %v2476_v3 }
 0x26d   : > { %v2478_v50 = vadd.f32 1e-05, %v2477_v31 }
 0x26f   : > { %3142 = vrsqrt.f32 %v2478_v50 }
 0x279   : > { %v3143_v26 = vpop.eup %3142 }
 0x27a   : > { %v2484_v24 = vmul.f32 %v3143_v26, %v2483_v12 }
 0x27c   : > { %v2486_v7 = vadd.f32 %v2485_v48, %v2484_v24 }
 0x27e   : > { %2488 = vst.msk [vmem:[%s280_s12] sm:$0xff] %vm2487_vm2, %v2486_v7 }
 0x27f PF: > { %s17_s21 = sadd.s32 1, %s3169_s21  }
 0x280   : > { %p14_p1 = scmp.ge.s32.totalorder %s17_s21, 5  }
 0x282   :  { %16 = sbr.rel (!%p14_p1) target bundleno = 1 (0x1), region = 82 }
 0x289   :  { %2508 = vsyncpa [#allocation3], 1 }
 0x28a   :  { %2510 = vsyncpa [#allocation3 + $0x1], 1 }

</bundles_post_ra>
